<compile_context>
chip_gen: v5e
topology: v5e:2x2
jax: 0.10.0
libtpu: 0.0.40
codegen_flags: <defaults>
</compile_context>

<pallas_src>
import jax
import jax.numpy as jnp
from jax.experimental import pallas as pl
from jax.experimental.pallas import tpu as pltpu


# ----------------------------------------------------------------------------
# Pallas kernel: fused (1 x kw) conv (tap reduction in-kernel) + BN affine + LeakyReLU.
# ----------------------------------------------------------------------------
def _make_conv1xk_kernel(tap_plan, n_phase, wo):
    """tap_plan[t] = (phase_index, column_offset) for tap t of the (1, kw) conv."""

    def kernel(*refs):
        x_refs = refs[:n_phase]
        w_ref, sb_ref, o_ref = refs[n_phase], refs[n_phase + 1], refs[n_phase + 2]
        tr, _, cout = o_ref.shape
        acc = None
        for t, (pi, off) in enumerate(tap_plan):
            a = x_refs[pi][:, off:off + wo, :]              # (tr, wo, cin) unstrided slice
            a = a.reshape(tr * wo, a.shape[-1])             # merge leading dims, lanes intact
            d = jnp.dot(a, w_ref[t], preferred_element_type=jnp.float32)
            acc = d if acc is None else acc + d
        y = acc * sb_ref[0:1, :] + sb_ref[1:2, :]           # folded BatchNorm affine (f32)
        y = jnp.where(y >= 0, y, 0.2 * y)                   # LeakyReLU(0.2)
        o_ref[...] = y.reshape(tr, wo, cout).astype(o_ref.dtype)

    return kernel


def _pick_row_tile(r, bytes_per_row, budget=6 << 20):
    """Largest divisor of r fitting the VMEM budget; prefer >=2 grid steps (v7x megacore)."""
    divisors = [d for d in range(1, r + 1) if r % d == 0]
    fit = [d for d in divisors if d * bytes_per_row <= budget] or [1]
    multi = [d for d in fit if r // d >= 2]
    return max(multi) if multi else max(fit)


def conv1x3_bn_lrelu(x, conv_p, bn_p, stride, padding, out_dtype):
    """Fused Conv2d(kernel=(1,kw)) + BatchNorm2d (running stats) + LeakyReLU(0.2).

    x: (B, H, W, Cin) NHWC.  Returns (B, Ho, Wo, Cout) in `out_dtype`.
    """
    sh, sw = stride
    pad_h, pad_w = padding
    w4 = conv_p["w"]                                        # (Cout, Cin, 1, kw) PyTorch layout
    cout, cin, kh, kw = w4.shape
    assert kh == 1
    b, h, w, cin_x = x.shape
    assert cin_x == cin
    ho = (h + 2 * pad_h - kh) // sh + 1
    wo = (w + 2 * pad_w - kw) // sw + 1

    # Fold BatchNorm (eval / running statistics) + conv bias into a single (2, Cout) slab.
    # TODO(synk): training-mode BatchNorm (batch statistics) is not implemented.
    scale = bn_p["gamma"] / jnp.sqrt(bn_p["var"] + 1e-5)
    bias = bn_p["beta"] + scale * (conv_p["b"] - bn_p["mean"])
    sb = jnp.stack([scale, bias]).astype(jnp.float32)       # (2, Cout)

    # Per-tap weight slabs (kw, Cin, Cout), bf16 for the MXU.
    wt = jnp.transpose(w4[:, :, 0, :], (2, 1, 0)).astype(jnp.bfloat16)

    # Zero-pad H/W (kh == 1, so padded H rows legitimately become bias-only rows, exactly
    # as in PyTorch), apply the H stride, and flatten (B, Ho) into one row axis.
    xp = jnp.pad(x.astype(jnp.bfloat16),
                 ((0, 0), (pad_h, pad_h), (pad_w, pad_w), (0, 0)))
    rows = xp[:, 0:(ho - 1) * sh + 1:sh, :, :].reshape(b * ho, w + 2 * pad_w, cin)

    # Split W into `sw` phases so every tap becomes an unstrided static slice in-kernel.
    phases = [rows[:, phase::sw, :] for phase in range(sw)]
    tap_plan = tuple((t % sw, t // sw) for t in range(kw))

    r = b * ho
    out_bytes = jnp.dtype(out_dtype).itemsize
    bytes_per_row = (2 * sum(phase.shape[1] for phase in phases) * cin * 2  # dbl-buffered bf16 in
                     + wo * cout * (4 + 2 * out_bytes))                     # f32 acc + output
    tr = _pick_row_tile(r, bytes_per_row)

    in_specs = [pl.BlockSpec((tr,) + phase.shape[1:], lambda i: (i, 0, 0)) for phase in phases]
    in_specs += [pl.BlockSpec(wt.shape, lambda i: (0, 0, 0)),
                 pl.BlockSpec(sb.shape, lambda i: (0, 0))]

    out = pl.pallas_call(
        _make_conv1xk_kernel(tap_plan, len(phases), wo),
        out_shape=jax.ShapeDtypeStruct((r, wo, cout), out_dtype),
        grid=(r // tr,),
        in_specs=in_specs,
        out_specs=pl.BlockSpec((tr, wo, cout), lambda i: (i, 0, 0)),
        compiler_params=pltpu.CompilerParams(dimension_semantics=("parallel",)),
    )(*phases, wt, sb)
    return out.reshape(b, ho, wo, cout)


# ----------------------------------------------------------------------------
# Module forward (NCHW in / NCHW out, NHWC + bf16 internally).
# ----------------------------------------------------------------------------
def en_down_conv_fwd(x_nchw, params):
    x = jnp.transpose(x_nchw, (0, 2, 3, 1))                                  # NCHW -> NHWC
    x = conv1x3_bn_lrelu(x, params["conv1"], params["bn1"],
                         stride=(2, 2), padding=(4, 1), out_dtype=jnp.bfloat16)
    x = conv1x3_bn_lrelu(x, params["conv2"], params["bn2"],
                         stride=(1, 1), padding=(2, 1), out_dtype=jnp.float32)
    return jnp.transpose(x, (0, 3, 1, 2))                                    # NHWC -> NCHW


# ----------------------------------------------------------------------------
# Pure-JAX reference (f32, highest precision) for a correctness check.
# ----------------------------------------------------------------------------
def _ref_block(x, conv_p, bn_p, stride, padding):
    y = jax.lax.conv_general_dilated(
        x, conv_p["w"], window_strides=stride,
        padding=[(padding[0], padding[0]), (padding[1], padding[1])],
        dimension_numbers=("NCHW", "OIHW", "NCHW"),
        precision=jax.lax.Precision.HIGHEST)
    y = y + conv_p["b"][None, :, None, None]
    scale = (bn_p["gamma"] / jnp.sqrt(bn_p["var"] + 1e-5))[None, :, None, None]
    y = (y - bn_p["mean"][None, :, None, None]) * scale + bn_p["beta"][None, :, None, None]
    return jnp.where(y >= 0, y, 0.2 * y)


def en_down_conv_ref(x, params):
    y = _ref_block(x, params["conv1"], params["bn1"], (2, 2), (4, 1))
    return _ref_block(y, params["conv2"], params["bn2"], (1, 1), (2, 1))


# ----------------------------------------------------------------------------
# Deterministic synthetic parameters.
# ----------------------------------------------------------------------------
def init_params(key, cin, cout):
    ks = jax.random.split(key, 12)

    def conv_p(k1, k2, ci, co):
        return {"w": 0.05 * jax.random.normal(k1, (co, ci, 1, 3), jnp.float32),
                "b": 0.05 * jax.random.normal(k2, (co,), jnp.float32)}

    def bn_p(k1, k2, k3, k4, c):
        return {"gamma": 1.0 + 0.1 * jax.random.normal(k1, (c,), jnp.float32),
                "beta": 0.1 * jax.random.normal(k2, (c,), jnp.float32),
                "mean": 0.1 * jax.random.normal(k3, (c,), jnp.float32),
                "var": 0.5 + jax.random.uniform(k4, (c,), jnp.float32)}

    return {"conv1": conv_p(ks[0], ks[1], cin, cout),
            "bn1": bn_p(ks[2], ks[3], ks[4], ks[5], cout),
            "conv2": conv_p(ks[6], ks[7], cout, cout),
            "bn2": bn_p(ks[8], ks[9], ks[10], ks[11], cout)}


# ----------------------------------------------------------------------------
if __name__ == "__main__":
    key = jax.random.PRNGKey(0)
    k_params, k_x = jax.random.split(key)

    # (B, Cin, F, T): frequency rows = 16, time cols = 32, ngf -> 2*ngf channels.
    B, CIN, COUT, H, W = 2, 32, 64, 16, 32
    params = init_params(k_params, CIN, COUT)
    x = jax.random.normal(k_x, (B, CIN, H, W), jnp.float32)

    fwd = jax.jit(en_down_conv_fwd)
    out = jax.block_until_ready(fwd(x, params))

    ref = en_down_conv_ref(x, params)
    assert out.shape == ref.shape, (out.shape, ref.shape)
    assert bool(jnp.all(jnp.isfinite(out)))
    max_err = float(jnp.max(jnp.abs(out - ref)))
    assert max_err < 5e-2, max_err
    print("KERNEL_OK")
</pallas_src>

<mosaic_0001>
module attributes {stable_mosaic.version = 11 : i64} {
  func.func @kernel(%arg0: i32, %arg1: memref<12x17x32xbf16, #tpu.memory_space<vmem>>, %arg2: memref<12x17x32xbf16, #tpu.memory_space<vmem>>, %arg3: memref<3x32x64xbf16, #tpu.memory_space<vmem>>, %arg4: memref<2x64xf32, #tpu.memory_space<vmem>>, %arg5: memref<12x16x64xbf16, #tpu.memory_space<vmem>>) attributes {dimension_semantics = [#tpu.dimension_semantics<parallel>], iteration_bounds = array<i64: 2>, scalar_prefetch = 0 : i64, scratch_operands = 0 : i64, tpu.core_type = #tpu.core_type<tc>, window_params = [{transform_indices = @transform_0, window_bounds = array<i64: 12, 17, 32>}, {transform_indices = @transform_1, window_bounds = array<i64: 12, 17, 32>}, {pipeline_mode = #tpu.pipeline_mode<synchronous>, transform_indices = @transform_2, window_bounds = array<i64: 3, 32, 64>}, {pipeline_mode = #tpu.pipeline_mode<synchronous>, transform_indices = @transform_3, window_bounds = array<i64: 2, 64>}, {transform_indices = @transform_4, window_bounds = array<i64: 12, 16, 64>}]} {
    %c0 = arith.constant 0 : index
    %c0_0 = arith.constant 0 : index
    %c0_1 = arith.constant 0 : index
    %0 = vector.load %arg1[%c0, %c0_0, %c0_1] : memref<12x17x32xbf16, #tpu.memory_space<vmem>>, vector<12x16x32xbf16>
    %1 = vector.shape_cast %0 : vector<12x16x32xbf16> to vector<192x32xbf16>
    %c0_2 = arith.constant 0 : index
    %c0_3 = arith.constant 0 : index
    %c0_4 = arith.constant 0 : index
    %2 = vector.load %arg3[%c0_2, %c0_3, %c0_4] : memref<3x32x64xbf16, #tpu.memory_space<vmem>>, vector<1x32x64xbf16>
    %3 = vector.shape_cast %2 : vector<1x32x64xbf16> to vector<32x64xbf16>
    %cst = arith.constant dense<0.000000e+00> : vector<192x64xf32>
    %4 = tpu.matmul %1, %3, %cst {dimension_numbers = #tpu.dot_dimension_numbers<[1], [0], [0], [1], [0, 0, 1, 1], [], []>} : vector<192x32xbf16>, vector<32x64xbf16>, vector<192x64xf32> -> vector<192x64xf32>
    %c0_5 = arith.constant 0 : index
    %c0_6 = arith.constant 0 : index
    %c0_7 = arith.constant 0 : index
    %5 = vector.load %arg2[%c0_5, %c0_6, %c0_7] : memref<12x17x32xbf16, #tpu.memory_space<vmem>>, vector<12x16x32xbf16>
    %6 = vector.shape_cast %5 : vector<12x16x32xbf16> to vector<192x32xbf16>
    %c1 = arith.constant 1 : index
    %c0_8 = arith.constant 0 : index
    %c0_9 = arith.constant 0 : index
    %7 = vector.load %arg3[%c1, %c0_8, %c0_9] : memref<3x32x64xbf16, #tpu.memory_space<vmem>>, vector<1x32x64xbf16>
    %8 = vector.shape_cast %7 : vector<1x32x64xbf16> to vector<32x64xbf16>
    %cst_10 = arith.constant dense<0.000000e+00> : vector<192x64xf32>
    %9 = tpu.matmul %6, %8, %cst_10 {dimension_numbers = #tpu.dot_dimension_numbers<[1], [0], [0], [1], [0, 0, 1, 1], [], []>} : vector<192x32xbf16>, vector<32x64xbf16>, vector<192x64xf32> -> vector<192x64xf32>
    %10 = arith.addf %4, %9 : vector<192x64xf32>
    %c0_11 = arith.constant 0 : index
    %c1_12 = arith.constant 1 : index
    %c0_13 = arith.constant 0 : index
    %11 = vector.load %arg1[%c0_11, %c1_12, %c0_13] : memref<12x17x32xbf16, #tpu.memory_space<vmem>>, vector<12x16x32xbf16>
    %12 = vector.shape_cast %11 : vector<12x16x32xbf16> to vector<192x32xbf16>
    %c2 = arith.constant 2 : index
    %c0_14 = arith.constant 0 : index
    %c0_15 = arith.constant 0 : index
    %13 = vector.load %arg3[%c2, %c0_14, %c0_15] : memref<3x32x64xbf16, #tpu.memory_space<vmem>>, vector<1x32x64xbf16>
    %14 = vector.shape_cast %13 : vector<1x32x64xbf16> to vector<32x64xbf16>
    %cst_16 = arith.constant dense<0.000000e+00> : vector<192x64xf32>
    %15 = tpu.matmul %12, %14, %cst_16 {dimension_numbers = #tpu.dot_dimension_numbers<[1], [0], [0], [1], [0, 0, 1, 1], [], []>} : vector<192x32xbf16>, vector<32x64xbf16>, vector<192x64xf32> -> vector<192x64xf32>
    %16 = arith.addf %10, %15 : vector<192x64xf32>
    %c0_17 = arith.constant 0 : index
    %c0_18 = arith.constant 0 : index
    %17 = vector.load %arg4[%c0_17, %c0_18] : memref<2x64xf32, #tpu.memory_space<vmem>>, vector<1x64xf32>
    %18 = vector.broadcast %17 : vector<1x64xf32> to vector<192x64xf32>
    %19 = arith.mulf %16, %18 : vector<192x64xf32>
    %c1_19 = arith.constant 1 : index
    %c0_20 = arith.constant 0 : index
    %20 = vector.load %arg4[%c1_19, %c0_20] : memref<2x64xf32, #tpu.memory_space<vmem>>, vector<1x64xf32>
    %21 = vector.broadcast %20 : vector<1x64xf32> to vector<192x64xf32>
    %22 = arith.addf %19, %21 : vector<192x64xf32>
    %cst_21 = arith.constant 0.000000e+00 : f32
    %23 = vector.broadcast %cst_21 : f32 to vector<192x64xf32>
    %24 = arith.cmpf oge, %22, %23 : vector<192x64xf32>
    %cst_22 = arith.constant 2.000000e-01 : f32
    %25 = vector.broadcast %cst_22 : f32 to vector<192x64xf32>
    %26 = arith.mulf %25, %22 : vector<192x64xf32>
    %27 = arith.select %24, %22, %26 : vector<192x64xi1>, vector<192x64xf32>
    %28 = vector.shape_cast %27 : vector<192x64xf32> to vector<12x16x64xf32>
    %29 = arith.truncf %28 : vector<12x16x64xf32> to vector<12x16x64xbf16>
    %c0_23 = arith.constant 0 : index
    %c0_24 = arith.constant 0 : index
    %c0_25 = arith.constant 0 : index
    %30 = vector.load %arg5[%c0_23, %c0_24, %c0_25] : memref<12x16x64xbf16, #tpu.memory_space<vmem>>, vector<12x16x64xbf16>
    tpu.vector_store %arg5[%c0_23, %c0_24, %c0_25], %29 {strides = array<i32>} : memref<12x16x64xbf16, #tpu.memory_space<vmem>>, vector<12x16x64xbf16>,
    return
  }
  func.func @transform_0(%arg0: i32) -> (i32, i32, i32) {
    %c0_i32 = arith.constant 0 : i32
    %c0_i32_0 = arith.constant 0 : i32
    %c0_i32_1 = arith.constant 0 : i32
    return %arg0, %c0_i32, %c0_i32_0 : i32, i32, i32
  }
  func.func @transform_1(%arg0: i32) -> (i32, i32, i32) {
    %c0_i32 = arith.constant 0 : i32
    %c0_i32_0 = arith.constant 0 : i32
    %c0_i32_1 = arith.constant 0 : i32
    return %arg0, %c0_i32, %c0_i32_0 : i32, i32, i32
  }
  func.func @transform_2(%arg0: i32) -> (i32, i32, i32) {
    %c0_i32 = arith.constant 0 : i32
    %c0_i32_0 = arith.constant 0 : i32
    %c0_i32_1 = arith.constant 0 : i32
    %c0_i32_2 = arith.constant 0 : i32
    return %c0_i32, %c0_i32_0, %c0_i32_1 : i32, i32, i32
  }
  func.func @transform_3(%arg0: i32) -> (i32, i32) {
    %c0_i32 = arith.constant 0 : i32
    %c0_i32_0 = arith.constant 0 : i32
    %c0_i32_1 = arith.constant 0 : i32
    return %c0_i32, %c0_i32_0 : i32, i32
  }
  func.func @transform_4(%arg0: i32) -> (i32, i32, i32) {
    %c0_i32 = arith.constant 0 : i32
    %c0_i32_0 = arith.constant 0 : i32
    %c0_i32_1 = arith.constant 0 : i32
    return %arg0, %c0_i32, %c0_i32_0 : i32, i32, i32
  }
}

module attributes {stable_mosaic.version = 11 : i64} {
  func.func @kernel(%arg0: i32, %arg1: memref<16x18x64xbf16, #tpu.memory_space<vmem>>, %arg2: memref<3x64x64xbf16, #tpu.memory_space<vmem>>, %arg3: memref<2x64xf32, #tpu.memory_space<vmem>>, %arg4: memref<16x16x64xf32, #tpu.memory_space<vmem>>) attributes {dimension_semantics = [#tpu.dimension_semantics<parallel>], iteration_bounds = array<i64: 2>, scalar_prefetch = 0 : i64, scratch_operands = 0 : i64, tpu.core_type = #tpu.core_type<tc>, window_params = [{transform_indices = @transform_0, window_bounds = array<i64: 16, 18, 64>}, {pipeline_mode = #tpu.pipeline_mode<synchronous>, transform_indices = @transform_1, window_bounds = array<i64: 3, 64, 64>}, {pipeline_mode = #tpu.pipeline_mode<synchronous>, transform_indices = @transform_2, window_bounds = array<i64: 2, 64>}, {transform_indices = @transform_3, window_bounds = array<i64: 16, 16, 64>}]} {
    %c0 = arith.constant 0 : index
    %c0_0 = arith.constant 0 : index
    %c0_1 = arith.constant 0 : index
    %0 = vector.load %arg1[%c0, %c0_0, %c0_1] : memref<16x18x64xbf16, #tpu.memory_space<vmem>>, vector<16x16x64xbf16>
    %1 = vector.shape_cast %0 : vector<16x16x64xbf16> to vector<256x64xbf16>
    %c0_2 = arith.constant 0 : index
    %c0_3 = arith.constant 0 : index
    %c0_4 = arith.constant 0 : index
    %2 = vector.load %arg2[%c0_2, %c0_3, %c0_4] : memref<3x64x64xbf16, #tpu.memory_space<vmem>>, vector<1x64x64xbf16>
    %3 = vector.shape_cast %2 : vector<1x64x64xbf16> to vector<64x64xbf16>
    %cst = arith.constant dense<0.000000e+00> : vector<256x64xf32>
    %4 = tpu.matmul %1, %3, %cst {dimension_numbers = #tpu.dot_dimension_numbers<[1], [0], [0], [1], [0, 0, 1, 1], [], []>} : vector<256x64xbf16>, vector<64x64xbf16>, vector<256x64xf32> -> vector<256x64xf32>
    %c0_5 = arith.constant 0 : index
    %c1 = arith.constant 1 : index
    %c0_6 = arith.constant 0 : index
    %5 = vector.load %arg1[%c0_5, %c1, %c0_6] : memref<16x18x64xbf16, #tpu.memory_space<vmem>>, vector<16x16x64xbf16>
    %6 = vector.shape_cast %5 : vector<16x16x64xbf16> to vector<256x64xbf16>
    %c1_7 = arith.constant 1 : index
    %c0_8 = arith.constant 0 : index
    %c0_9 = arith.constant 0 : index
    %7 = vector.load %arg2[%c1_7, %c0_8, %c0_9] : memref<3x64x64xbf16, #tpu.memory_space<vmem>>, vector<1x64x64xbf16>
    %8 = vector.shape_cast %7 : vector<1x64x64xbf16> to vector<64x64xbf16>
    %cst_10 = arith.constant dense<0.000000e+00> : vector<256x64xf32>
    %9 = tpu.matmul %6, %8, %cst_10 {dimension_numbers = #tpu.dot_dimension_numbers<[1], [0], [0], [1], [0, 0, 1, 1], [], []>} : vector<256x64xbf16>, vector<64x64xbf16>, vector<256x64xf32> -> vector<256x64xf32>
    %10 = arith.addf %4, %9 : vector<256x64xf32>
    %c0_11 = arith.constant 0 : index
    %c2 = arith.constant 2 : index
    %c0_12 = arith.constant 0 : index
    %11 = vector.load %arg1[%c0_11, %c2, %c0_12] : memref<16x18x64xbf16, #tpu.memory_space<vmem>>, vector<16x16x64xbf16>
    %12 = vector.shape_cast %11 : vector<16x16x64xbf16> to vector<256x64xbf16>
    %c2_13 = arith.constant 2 : index
    %c0_14 = arith.constant 0 : index
    %c0_15 = arith.constant 0 : index
    %13 = vector.load %arg2[%c2_13, %c0_14, %c0_15] : memref<3x64x64xbf16, #tpu.memory_space<vmem>>, vector<1x64x64xbf16>
    %14 = vector.shape_cast %13 : vector<1x64x64xbf16> to vector<64x64xbf16>
    %cst_16 = arith.constant dense<0.000000e+00> : vector<256x64xf32>
    %15 = tpu.matmul %12, %14, %cst_16 {dimension_numbers = #tpu.dot_dimension_numbers<[1], [0], [0], [1], [0, 0, 1, 1], [], []>} : vector<256x64xbf16>, vector<64x64xbf16>, vector<256x64xf32> -> vector<256x64xf32>
    %16 = arith.addf %10, %15 : vector<256x64xf32>
    %c0_17 = arith.constant 0 : index
    %c0_18 = arith.constant 0 : index
    %17 = vector.load %arg3[%c0_17, %c0_18] : memref<2x64xf32, #tpu.memory_space<vmem>>, vector<1x64xf32>
    %18 = vector.broadcast %17 : vector<1x64xf32> to vector<256x64xf32>
    %19 = arith.mulf %16, %18 : vector<256x64xf32>
    %c1_19 = arith.constant 1 : index
    %c0_20 = arith.constant 0 : index
    %20 = vector.load %arg3[%c1_19, %c0_20] : memref<2x64xf32, #tpu.memory_space<vmem>>, vector<1x64xf32>
    %21 = vector.broadcast %20 : vector<1x64xf32> to vector<256x64xf32>
    %22 = arith.addf %19, %21 : vector<256x64xf32>
    %cst_21 = arith.constant 0.000000e+00 : f32
    %23 = vector.broadcast %cst_21 : f32 to vector<256x64xf32>
    %24 = arith.cmpf oge, %22, %23 : vector<256x64xf32>
    %cst_22 = arith.constant 2.000000e-01 : f32
    %25 = vector.broadcast %cst_22 : f32 to vector<256x64xf32>
    %26 = arith.mulf %25, %22 : vector<256x64xf32>
    %27 = arith.select %24, %22, %26 : vector<256x64xi1>, vector<256x64xf32>
    %28 = vector.shape_cast %27 : vector<256x64xf32> to vector<16x16x64xf32>
    %c0_23 = arith.constant 0 : index
    %c0_24 = arith.constant 0 : index
    %c0_25 = arith.constant 0 : index
    %29 = vector.load %arg4[%c0_23, %c0_24, %c0_25] : memref<16x16x64xf32, #tpu.memory_space<vmem>>, vector<16x16x64xf32>
    tpu.vector_store %arg4[%c0_23, %c0_24, %c0_25], %28 {strides = array<i32>} : memref<16x16x64xf32, #tpu.memory_space<vmem>>, vector<16x16x64xf32>,
    return
  }
  func.func @transform_0(%arg0: i32) -> (i32, i32, i32) {
    %c0_i32 = arith.constant 0 : i32
    %c0_i32_0 = arith.constant 0 : i32
    %c0_i32_1 = arith.constant 0 : i32
    return %arg0, %c0_i32, %c0_i32_0 : i32, i32, i32
  }
  func.func @transform_1(%arg0: i32) -> (i32, i32, i32) {
    %c0_i32 = arith.constant 0 : i32
    %c0_i32_0 = arith.constant 0 : i32
    %c0_i32_1 = arith.constant 0 : i32
    %c0_i32_2 = arith.constant 0 : i32
    return %c0_i32, %c0_i32_0, %c0_i32_1 : i32, i32, i32
  }
  func.func @transform_2(%arg0: i32) -> (i32, i32) {
    %c0_i32 = arith.constant 0 : i32
    %c0_i32_0 = arith.constant 0 : i32
    %c0_i32_1 = arith.constant 0 : i32
    return %c0_i32, %c0_i32_0 : i32, i32
  }
  func.func @transform_3(%arg0: i32) -> (i32, i32, i32) {
    %c0_i32 = arith.constant 0 : i32
    %c0_i32_0 = arith.constant 0 : i32
    %c0_i32_1 = arith.constant 0 : i32
    return %arg0, %c0_i32, %c0_i32_0 : i32, i32, i32
  }
}

</mosaic_0001>

<bundles_post_ra>
// kernel: en_down_conv_fwd.2
= control target key start
LH: loop header
LB: loop body
LE: loop exit
PB: predicated region body
PF: predicated region fallthrough
CT: control target
= control target key end

     0   :  { %s1652_s15 = smov 0   ;;  %s1992_s0 = inlined_call_operand.vmem [shape: bf16[24,17,32], index: 0, kind: input, shape index: {}]   ;;  %s1993_s1 = inlined_call_operand.vmem [shape: bf16[24,17,32], index: 1, kind: input, shape index: {}]   ;;  %s1994_s2 = inlined_call_operand.vmem [shape: bf16[3,32,64], index: 2, kind: input, shape index: {}]   ;;  %s1995_s3 = inlined_call_operand.vmem [shape: f32[2,64], index: 3, kind: input, shape index: {}]   ;;  %s1996_s4 = inlined_call_operand.vmem [shape: bf16[24,16,64], index: 4, kind: output, shape index: {}]  }
   0x1 LB: > { %s1396_s16 = sadd.s32 4294967295, %s1625_s15   ;;  %p1400_p0 = scmp.ge.s32.totalorder %s1625_s15, 1  ;;  %s1625_s15 = sphi %s1652_s15, %s14_s15  }
   0x2   : > { %p176_p1 = scmp.lt.s32.totalorder %s1625_s15, 3 }
   0x4   : > { %p177_p2 = pnand %p1400_p0, %p176_p1 }
   0x5   : > { %s210_s19 = smul.u32 (!%p177_p2), 12, %s1396_s16 }
   0x6   : > { %180 = sbr.rel (%p177_p2) target bundleno = 311 (0x137), region = 36 }
   0x7   : > { %p211_p3 = scmp.lt.s32.totalorder (!%p177_p2), %s210_s19, 23 }
   0xb   : > { %v1599_v0 = vld [vmem:[%s1994_s2 + $0x18] sm:$0xff]  ;;  %v1585_v1 = vld [vmem:[%s1994_s2 + $0x8] sm:$0xff]  ;;  %v1598_v3 = vld [vmem:[%s1994_s2 + $0x10] sm:$0xff]  ;;  %s2000_s19 = smov (!%p211_p3, %s210_s19), 23  ;;  %vm361_vm0 = vcmask 261120   ;;  %vm1301_vm5 = vcmask 519168  }
   0xc   : > { %v1601_v2 = vld [vmem:[%s1994_s2 + $0x28] sm:$0xff]  ;;  %1602 = vmatpush.bf16.msra.mxu3 %v1599_v0  ;;  %404 = vmatpush.bf16.msra.mxu0 %v1599_v0  ;;  %v1584_v4 = vld [vmem:[%s1994_s2] sm:$0xff]  ;;  %s1608_s30 = smul.u32 12, %s2000_s19  ;;  %vm680_vm1 = vsmask.f32 3328  ;;  %s1571_s16 = sshll.u32 %s2000_s19, 3 }
   0xd   : > { %581 = vmatpush.bf16.msra.mxu1 %v1585_v1  ;;  %1066 = vmatpush.bf16.msra.mxu2 %v1601_v2  ;;  %v1600_v5 = vld [vmem:[%s1994_s2 + $0x20] sm:$0xff]  ;;  %vm681_vm2 = vsmask.f32 7440  ;;  %s1863_s20 = scalar_lea.vmem %s1996_s4, %s1571_s16 }
   0xe   : > { %s1684_s7 = scalar_lea.vmem %s1992_s0, %s1608_s30  ;;  %s1689_s10 = scalar_lea.vmem %s1993_s1, %s1608_s30  ;;  %vm1704_vm3 = vmor %vm680_vm1, %vm681_vm2  ;;  %v1848_v30 = vld [vmem:[%s1995_s3] ss:$0 sm:$0xff] }
   0xf   : > { %v1595_v6 = vld [vmem:[%s1689_s10 + $0x6c] sm:$0xff]  ;;  %v1586_v7 = vld [vmem:[%s1689_s10] sm:$0xff]  ;;  %v646_v11 = vld [vmem:[%s1684_s7 + $0x8] sm:$0x1] }
  0x10   : > { %1603 = vmatpush.bf16.msra.mxu3 %v1598_v3  ;;  %405 = vmatpush.bf16.msra.mxu0 %v1598_v3  ;;  %v1572_v8 = vld [vmem:[%s1684_s7] sm:$0xff]  ;;  %v703_v16 = vshll.u32 %v646_v11, 16  ;;  %v647_v17 = vld [vmem:[%s1684_s7 + $0xc] sm:$0xf]  ;;  %v648_v18 = vld [vmem:[%s1684_s7 + $0x10] sm:$0xf] }
  0x11   : > { %582 = vmatpush.bf16.msra.mxu1 %v1584_v4  ;;  %1067 = vmatpush.bf16.msra.mxu2 %v1600_v5  ;;  %v644_v9 = vld [vmem:[%s1684_s7] sm:$0xf]  ;;  %v645_v10 = vld [vmem:[%s1684_s7 + $0x4] sm:$0xf]  ;;  %v708_v23 = vshrl.u32 %v647_v17, 16  ;;  %v711_v24 = vshll.u32 %v647_v17, 16 }
  0x12   : > { %v684_v12 = vshrl.u32 %v644_v9, 16  ;;  %v687_v13 = vshll.u32 %v644_v9, 16  ;;  %v693_v14 = vshll.u32 %v645_v10, 16  ;;  %v697_v15 = vshrl.u32 %v645_v10, 16  ;;  %v649_v37 = vld [vmem:[%s1684_s7 + $0x14] sm:$0x1] }
  0x13   : > { %1474 = vmatmul.msk.bf16.vlgmr.msra.gmra.mxu3 %vm361_vm0, %v1595_v6  ;;  %1465 = vmatmul.msk.bf16.vlgmr.msra.gmra.mxu0 %vm361_vm0, %v1586_v7  ;;  %v717_v25 = vshll.u32 %v648_v18, 16  ;;  %v705_v28 = vrot.slane %v703_v16, 5  ;;  %v721_v29 = vshrl.u32 %v648_v18, 16  ;;  %v710_v31 = vrot.slane %v708_v23, 4  ;;  %v1596_v46 = vld [vmem:[%s1689_s10 + $0x78] sm:$0xff]  ;;  %v1587_v47 = vld [vmem:[%s1689_s10 + $0xc] sm:$0xff] }
  0x14   : > { %1604 = vmatpush.bf16.msrb.mxu3 %v1585_v1  ;;  %1533 = vmatmul.msk.bf16.vlgmr.msra.gmra.mxu1 %vm361_vm0, %v1572_v8  ;;  %v686_v19 = vrot.slane %v684_v12, 4  ;;  %v689_v20 = vrot.slane %v687_v13, 5  ;;  %v695_v21 = vrot.slane %v693_v14, 5  ;;  %v699_v22 = vrot.slane %v697_v15, 4  ;;  %v1573_v48 = vld [vmem:[%s1684_s7 + $0xc] sm:$0xff]  ;;  %v1597_v7 = vld [vmem:[%s1689_s10 + $0x84] sm:$0xff] }
  0x15   : > { %v713_v32 = vrot.slane %v711_v24, 5  ;;  %v719_v35 = vrot.slane %v717_v25, 5  ;;  %v723_v36 = vrot.slane %v721_v29, 4  ;;  %v727_v44 = vshll.u32 %v649_v37, 16  ;;  %v650_v49 = vld [vmem:[%s1684_s7 + $0x18] sm:$0xf] }
  0x16   : > { %v690_v26 = vor.u32 %v689_v20, %v686_v19  ;;  %v700_v27 = vor.u32 %v699_v22, %v695_v21  ;;  %v651_v53 = vld [vmem:[%s1684_s7 + $0x1c] sm:$0xf]  ;;  %v732_v54 = vshrl.u32 %v650_v49, 16  ;;  %v735_v55 = vshll.u32 %v650_v49, 16  ;;  %v653_v13 = vld [vmem:[%s1684_s7 + $0x24] sm:$0xf] }
  0x17   : > { %v714_v42 = vor.u32 %v713_v32, %v710_v31  ;;  %v724_v43 = vor.u32 %v723_v36, %v719_v35  ;;  %v729_v52 = vrot.slane %v727_v44, 5  ;;  %v741_v56 = vshll.u32 %v651_v53, 16  ;;  %v1588_v8 = vld [vmem:[%s1689_s10 + $0x18] sm:$0xff]  ;;  %v654_v14 = vld [vmem:[%s1684_s7 + $0x28] sm:$0xf] }
  0x18   : > { %1605 = vmatpush.bf16.msrb.mxu3 %v1584_v4  ;;  %v691_v33 = vrot.slane %v690_v26, 4  ;;  %v701_v34 = vrot.slane %v700_v27, 4  ;;  %v745_v57 = vshrl.u32 %v651_v53, 16  ;;  %v734_v60 = vrot.slane %v732_v54, 4  ;;  %v1574_v9 = vld [vmem:[%s1684_s7 + $0x18] sm:$0xff]  ;;  %v1575_v37 = vld [vmem:[%s1684_s7 + $0x24] sm:$0xff] }
  0x19   : > { %v715_v50 = vrot.slane %v714_v42, 4  ;;  %v725_v51 = vrot.slane %v724_v43, 4  ;;  %v737_v61 = vrot.slane %v735_v55, 5  ;;  %v743_v0 = vrot.slane %v741_v56, 5  ;;  %v655_v27 = vld [vmem:[%s1684_s7 + $0x2c] sm:$0x1] }
  0x1a   : > { %v696_v38 = vsel %vm1704_vm3, %v691_v33, %v695_v21  ;;  %v706_v39 = vsel %vm1704_vm3, %v701_v34, %v705_v28  ;;  %v747_v1 = vrot.slane %v745_v57, 4  ;;  %v756_v17 = vshrl.u32 %v653_v13, 16  ;;  %v1581_v33 = vld [vmem:[%s1684_s7 + $0x6c] sm:$0xff]  ;;  %v1589_v34 = vld [vmem:[%s1689_s10 + $0x24] sm:$0xff]  ;;  %v657_v36 = vld [vmem:[%s1684_s7 + $0x34] sm:$0xf] }
  0x1b   : > { %v976_v40 = vunpack.c.l.b16 %v696_v38  ;;  %v977_v41 = vunpack.c.l.b16 %v706_v39  ;;  %v720_v58 = vsel %vm1704_vm3, %v715_v50, %v719_v35  ;;  %v730_v59 = vsel %vm1704_vm3, %v725_v51, %v729_v52  ;;  %v656_v35 = vld [vmem:[%s1684_s7 + $0x30] sm:$0xf]  ;;  %v658_v51 = vld [vmem:[%s1684_s7 + $0x38] sm:$0x1] }
  0x1c   : > { %1606 = vmatpush.bf16.msra.mxu3 %v1601_v2  ;;  %v978_v62 = vunpack.c.l.b16 %v720_v58  ;;  %v979_v63 = vunpack.c.l.b16 %v730_v59  ;;  %v652_v2 = vld [vmem:[%s1684_s7 + $0x20] sm:$0x1]  ;;  %v738_v4 = vor.u32 %v737_v61, %v734_v60  ;;  %v759_v18 = vshll.u32 %v653_v13, 16  ;;  %v1582_v61 = vld [vmem:[%s1684_s7 + $0x78] sm:$0xff] }
  0x1d   : > { %v1000_v45 = vpack.c.b16 %v977_v41, %v976_v40  ;;  %v751_v6 = vshll.u32 %v652_v2, 16  ;;  %v765_v19 = vshll.u32 %v654_v14, 16  ;;  %v769_v20 = vshrl.u32 %v654_v14, 16 }
  0x1e   : > { %v1001_v3 = vpack.c.b16 %v979_v63, %v978_v62  ;;  %v739_v10 = vrot.slane %v738_v4, 4  ;;  %v758_v23 = vrot.slane %v756_v17, 4  ;;  %v761_v24 = vrot.slane %v759_v18, 5  ;;  %v1590_v62 = vld [vmem:[%s1689_s10 + $0x30] sm:$0xff] }
  0x1f   : > { %1557 = vmatmul.msk.bf16.vlgmr.msra.gmra.mxu2 %vm361_vm0, %v1000_v45  ;;  %v753_v12 = vrot.slane %v751_v6, 5  ;;  %v767_v25 = vrot.slane %v765_v19, 5  ;;  %v771_v26 = vrot.slane %v769_v20, 4  ;;  %v775_v32 = vshll.u32 %v655_v27, 16  ;;  %v1576_v63 = vld [vmem:[%s1684_s7 + $0x30] sm:$0xff] }
  0x20   : > { %1607 = vmatpush.bf16.msra.mxu3 %v1600_v5  ;;  %v748_v5 = vor.u32 %v747_v1, %v743_v0  ;;  %v744_v15 = vsel %vm1704_vm3, %v739_v10, %v743_v0  ;;  %v762_v29 = vor.u32 %v761_v24, %v758_v23  ;;  %v780_v41 = vshrl.u32 %v656_v35, 16  ;;  %v659_v0 = vld [vmem:[%s1684_s7 + $0x3c] sm:$0xf]  ;;  %v660_v1 = vld [vmem:[%s1684_s7 + $0x40] sm:$0xf] }
  0x21   : > { %v980_v21 = vunpack.c.l.b16 %v744_v15  ;;  %v772_v31 = vor.u32 %v771_v26, %v767_v25  ;;  %v777_v40 = vrot.slane %v775_v32, 5  ;;  %v783_v42 = vshll.u32 %v656_v35, 16  ;;  %v663_v32 = vld [vmem:[%s1684_s7 + $0x4c] sm:$0xf] }
  0x22   : > { %v749_v11 = vrot.slane %v748_v5, 4  ;;  %v763_v38 = vrot.slane %v762_v29, 4  ;;  %v789_v43 = vshll.u32 %v657_v36, 16  ;;  %v793_v44 = vshrl.u32 %v657_v36, 16  ;;  %v673_v29 = vld [vmem:[%s1684_s7 + $0x74] sm:$0x1] }
  0x23   : > { %1475 = vmatmul.msk.bf16.gmra.mxu3 %vm361_vm0, %v1596_v46  ;;  %1466 = vmatmul.msk.bf16.gmra.mxu0 %vm361_vm0, %v1587_v47  ;;  %v773_v39 = vrot.slane %v772_v31, 4  ;;  %v782_v47 = vrot.slane %v780_v41, 4  ;;  %v799_v56 = vshll.u32 %v658_v51, 16  ;;  %v804_v4 = vshrl.u32 %v659_v0, 16  ;;  %v662_v31 = vld [vmem:[%s1684_s7 + $0x48] sm:$0xf] }
  0x24   : > { %1534 = vmatmul.msk.bf16.gmra.mxu1 %vm361_vm0, %v1573_v48  ;;  %v754_v16 = vsel %vm1704_vm3, %v749_v11, %v753_v12  ;;  %v768_v45 = vsel %vm1704_vm3, %v763_v38, %v767_v25  ;;  %v785_v48 = vrot.slane %v783_v42, 5  ;;  %v791_v49 = vrot.slane %v789_v43, 5 }
  0x25   : > { %v981_v22 = vunpack.c.l.b16 %v754_v16  ;;  %v778_v46 = vsel %vm1704_vm3, %v773_v39, %v777_v40  ;;  %v795_v50 = vrot.slane %v793_v44, 4  ;;  %v982_v52 = vunpack.c.l.b16 %v768_v45  ;;  %v661_v16 = vld [vmem:[%s1684_s7 + $0x44] sm:$0x1] }
  0x26   : > { %v983_v53 = vunpack.c.l.b16 %v778_v46  ;;  %v786_v54 = vor.u32 %v785_v48, %v782_v47  ;;  %v801_v60 = vrot.slane %v799_v56, 5  ;;  %v807_v5 = vshll.u32 %v659_v0, 16  ;;  %v674_v47 = vld [vmem:[%s1684_s7 + $0x78] sm:$0xf]  ;;  %v675_v48 = vld [vmem:[%s1684_s7 + $0x7c] sm:$0xf] }
  0x27   : > { %v1002_v28 = vpack.c.b16 %v981_v22, %v980_v21  ;;  %v796_v55 = vor.u32 %v795_v50, %v791_v49  ;;  %v813_v6 = vshll.u32 %v660_v1, 16  ;;  %v806_v12 = vrot.slane %v804_v4, 4 }
  0x28   : > { %v1003_v57 = vpack.c.b16 %v983_v53, %v982_v52  ;;  %v787_v58 = vrot.slane %v786_v54, 4  ;;  %v809_v13 = vrot.slane %v807_v5, 5  ;;  %v823_v24 = vshll.u32 %v661_v16, 16 }
  0x29   : > { %v797_v59 = vrot.slane %v796_v55, 4  ;;  %v815_v14 = vrot.slane %v813_v6, 5  ;;  %v919_v41 = vshll.u32 %v673_v29, 16  ;;  %v828_v42 = vshrl.u32 %v662_v31, 16 }
  0x2a   : > { %v792_v2 = vsel %vm1704_vm3, %v787_v58, %v791_v49  ;;  %v810_v22 = vor.u32 %v809_v13, %v806_v12  ;;  %v825_v36 = vrot.slane %v823_v24, 5  ;;  %v831_v43 = vshll.u32 %v662_v31, 16 }
  0x2b   : > { %v984_v10 = vunpack.c.l.b16 %v792_v2  ;;  %v837_v44 = vshll.u32 %v663_v32, 16  ;;  %v841_v45 = vshrl.u32 %v663_v32, 16  ;;  %v921_v52 = vrot.slane %v919_v41, 5 }
  0x2c   : > { %v811_v35 = vrot.slane %v810_v22, 4  ;;  %v830_v53 = vrot.slane %v828_v42, 4  ;;  %v833_v54 = vrot.slane %v831_v43, 5  ;;  %v924_v58 = vshrl.u32 %v674_v47, 16  ;;  %v665_v22 = vld [vmem:[%s1684_s7 + $0x54] sm:$0xf] }
  0x2d   : > { %v839_v55 = vrot.slane %v837_v44, 5  ;;  %v843_v56 = vrot.slane %v841_v45, 4  ;;  %v852_v29 = vshrl.u32 %v665_v22, 16  ;;  %v855_v31 = vshll.u32 %v665_v22, 16  ;;  %v667_v44 = vld [vmem:[%s1684_s7 + $0x5c] sm:$0x1] }
  0x2e   : > { %v816_v46 = vsel %vm1704_vm3, %v811_v35, %v815_v14  ;;  %v834_v2 = vor.u32 %v833_v54, %v830_v53  ;;  %v926_v5 = vrot.slane %v924_v58, 4  ;;  %v678_v35 = vld [vmem:[%s1684_s7 + $0x88] sm:$0xf]  ;;  %v871_v54 = vshll.u32 %v667_v44, 16 }
  0x2f   : > { %1558 = vmatmul.msk.bf16.gmra.mxu2 %vm361_vm0, %v1001_v3  ;;  %v802_v3 = vsel %vm1704_vm3, %v797_v59, %v801_v60  ;;  %v927_v59 = vshll.u32 %v674_v47, 16  ;;  %v933_v60 = vshll.u32 %v675_v48, 16  ;;  %v857_v41 = vrot.slane %v855_v31, 5 }
  0x30   : > { %v985_v11 = vunpack.c.l.b16 %v802_v3  ;;  %v844_v3 = vor.u32 %v843_v56, %v839_v55  ;;  %v835_v13 = vrot.slane %v834_v2, 4  ;;  %v957_v47 = vshll.u32 %v678_v35, 16 }
  0x31   : > { %v929_v6 = vrot.slane %v927_v59, 5  ;;  %v679_v59 = vld [vmem:[%s1684_s7 + $0x8c] sm:$0x1] }
  0x32   : > { %v1004_v21 = vpack.c.b16 %v985_v11, %v984_v10  ;;  %v676_v11 = vld [vmem:[%s1684_s7 + $0x80] sm:$0x1]  ;;  %v840_v24 = vsel %vm1704_vm3, %v835_v13, %v839_v55 }
  0x33   : > { %1476 = vmatmul.msk.bf16.gmra.mxu3 %vm361_vm0, %v1597_v7  ;;  %1467 = vmatmul.msk.bf16.gmra.mxu0 %vm361_vm0, %v1588_v8  ;;  %v817_v7 = vshrl.u32 %v660_v1, 16  ;;  %v671_v8 = vld [vmem:[%s1684_s7 + $0x6c] sm:$0xf]  ;;  %v930_v16 = vor.u32 %v929_v6, %v926_v5  ;;  %v668_v5 = vld [vmem:[%s1684_s7 + $0x60] sm:$0xf] }
  0x34   : > { %1535 = vmatmul.msk.bf16.gmra.mxu1 %vm361_vm0, %v1574_v9  ;;  %v672_v9 = vld [vmem:[%s1684_s7 + $0x70] sm:$0xf]  ;;  %v900_v17 = vshrl.u32 %v671_v8, 16  ;;  %v903_v18 = vshll.u32 %v671_v8, 16  ;;  %v669_v6 = vld [vmem:[%s1684_s7 + $0x64] sm:$0xf] }
  0x35   : > { %v819_v15 = vrot.slane %v817_v7, 4  ;;  %v909_v19 = vshll.u32 %v672_v9, 16  ;;  %v913_v20 = vshrl.u32 %v672_v9, 16  ;;  %v935_v7 = vrot.slane %v933_v60, 5 }
  0x36   : > { %v902_v25 = vrot.slane %v900_v17, 4  ;;  %v905_v26 = vrot.slane %v903_v18, 5  ;;  %v943_v18 = vshll.u32 %v676_v11, 16  ;;  %v879_v13 = vshll.u32 %v668_v5, 16 }
  0x37   : > { %v820_v23 = vor.u32 %v819_v15, %v815_v14  ;;  %v911_v27 = vrot.slane %v909_v19, 5  ;;  %v845_v15 = vrot.slane %v844_v3, 4 }
  0x38   : > { %v906_v39 = vor.u32 %v905_v26, %v902_v25  ;;  %v931_v26 = vrot.slane %v930_v16, 4 }
  0x39   : > { %v821_v38 = vrot.slane %v820_v23, 4  ;;  %v666_v23 = vld [vmem:[%s1684_s7 + $0x58] sm:$0xf] }
  0x3a   : > { %v907_v50 = vrot.slane %v906_v39, 4  ;;  %v861_v32 = vshll.u32 %v666_v23, 16 }
  0x3b   : > { %v826_v49 = vsel %vm1704_vm3, %v821_v38, %v825_v36  ;;  %v988_v36 = vunpack.c.l.b16 %v840_v24  ;;  %v936_v38 = vsel %vm1704_vm3, %v931_v26, %v935_v7  ;;  %v670_v24 = vld [vmem:[%s1684_s7 + $0x68] sm:$0x1] }
  0x3c   : > { %v912_v0 = vsel %vm1704_vm3, %v907_v50, %v911_v27  ;;  %v863_v42 = vrot.slane %v861_v32, 5  ;;  %v996_v50 = vunpack.c.l.b16 %v936_v38  ;;  %v895_v31 = vshll.u32 %v670_v24, 16 }
  0x3d   : > { %v994_v9 = vunpack.c.l.b16 %v912_v0  ;;  %v1579_v0 = vld [vmem:[%s1684_s7 + $0x54] sm:$0xff] }
  0x3f   : > { %1559 = vmatmul.msk.bf16.gmra.mxu2 %vm361_vm0, %v1002_v28  ;;  %v915_v28 = vrot.slane %v913_v20, 4  ;;  %v1592_v20 = vld [vmem:[%s1689_s10 + $0x48] sm:$0xff] }
  0x41   : > { %v916_v40 = vor.u32 %v915_v28, %v911_v27  ;;  %v945_v28 = vrot.slane %v943_v18, 5 }
  0x43   : > { %1542 = vmatmul.msk.bf16.vlgmr.msrb.gmra.mxu3 %vm361_vm0, %v1581_v33  ;;  %1468 = vmatmul.msk.bf16.gmra.mxu0 %vm361_vm0, %v1589_v34  ;;  %v1583_v33 = vld [vmem:[%s1684_s7 + $0x84] sm:$0xff]  ;;  %v1591_v34 = vld [vmem:[%s1689_s10 + $0x3c] sm:$0xff]  ;;  %v917_v51 = vrot.slane %v916_v40, 4  ;;  %v854_v40 = vrot.slane %v852_v29, 4 }
  0x44   : > { %1536 = vmatmul.msk.bf16.gmra.mxu1 %vm361_vm0, %v1575_v37  ;;  %v1577_v37 = vld [vmem:[%s1684_s7 + $0x3c] sm:$0xff] }
  0x45   : > { %v922_v1 = vsel %vm1704_vm3, %v917_v51, %v921_v52  ;;  %v858_v52 = vor.u32 %v857_v41, %v854_v40 }
  0x46   : > { %v995_v10 = vunpack.c.l.b16 %v922_v1 }
  0x48   : > { %v1009_v19 = vpack.c.b16 %v995_v10, %v994_v9 }
  0x4f   : > { %1560 = vmatmul.msk.bf16.gmra.mxu2 %vm361_vm0, %v1003_v57  ;;  %v664_v57 = vld [vmem:[%s1684_s7 + $0x50] sm:$0x1] }
  0x50   : > { %v847_v4 = vshll.u32 %v664_v57, 16  ;;  %v959_v57 = vrot.slane %v957_v47, 5 }
  0x52   : > { %v849_v14 = vrot.slane %v847_v4, 5  ;;  %v967_v4 = vshll.u32 %v679_v59, 16 }
  0x53   : > { %1543 = vmatmul.msk.bf16.gmra.mxu3 %vm361_vm0, %v1582_v61  ;;  %1469 = vmatmul.msk.bf16.gmra.mxu0 %vm361_vm0, %v1590_v62  ;;  %v937_v61 = vshrl.u32 %v675_v48, 16  ;;  %v986_v62 = vunpack.c.l.b16 %v816_v46  ;;  %v961_v48 = vshrl.u32 %v678_v35, 16  ;;  %v1580_v35 = vld [vmem:[%s1684_s7 + $0x60] sm:$0xff] }
  0x54   : > { %1537 = vmatmul.msk.bf16.gmra.mxu1 %vm361_vm0, %v1576_v63  ;;  %v987_v63 = vunpack.c.l.b16 %v826_v49  ;;  %v850_v25 = vsel %vm1704_vm3, %v845_v15, %v849_v14  ;;  %v969_v11 = vrot.slane %v967_v4, 5  ;;  %v885_v14 = vshll.u32 %v669_v6, 16 }
  0x55   : > { %v939_v8 = vrot.slane %v937_v61, 4  ;;  %v963_v58 = vrot.slane %v961_v48, 4  ;;  %v1593_v61 = vld [vmem:[%s1689_s10 + $0x54] sm:$0xff]  ;;  %v889_v15 = vshrl.u32 %v669_v6, 16 }
  0x56   : > { %v1005_v12 = vpack.c.b16 %v987_v63, %v986_v62  ;;  %v859_v62 = vrot.slane %v858_v52, 4  ;;  %v873_v63 = vrot.slane %v871_v54, 5  ;;  %v887_v22 = vrot.slane %v885_v14, 5  ;;  %v1853_v54 = vld [vmem:[%s1995_s3 + $0x1] ss:$0 sm:$0xff] }
  0x57   : > { %v940_v17 = vor.u32 %v939_v8, %v935_v7  ;;  %v964_v3 = vor.u32 %v963_v58, %v959_v57 }
  0x58   : > { %v864_v7 = vsel %vm1704_vm3, %v859_v62, %v863_v42 }
  0x59   : > { %v941_v27 = vrot.slane %v940_v17, 4  ;;  %v965_v10 = vrot.slane %v964_v3, 4  ;;  %v990_v16 = vunpack.c.l.b16 %v864_v7 }
  0x5b   : > { %v946_v39 = vsel %vm1704_vm3, %v941_v27, %v945_v28 }
  0x5c   : > { %v997_v51 = vunpack.c.l.b16 %v946_v39  ;;  %v897_v39 = vrot.slane %v895_v31, 5 }
  0x5e   : > { %v1010_v60 = vpack.c.b16 %v997_v51, %v996_v50 }
  0x5f   : > { %1561 = vmatmul.msk.bf16.gmra.mxu2 %vm361_vm0, %v1004_v21  ;;  %v1578_v21 = vld [vmem:[%s1684_s7 + $0x48] sm:$0xff] }
  0x63   : > { %1544 = vmatmul.msk.bf16.gmra.mxu3 %vm361_vm0, %v1583_v33  ;;  %1470 = vmatmul.msk.bf16.gmra.mxu0 %vm361_vm0, %v1591_v34  ;;  %v865_v33 = vshrl.u32 %v666_v23, 16  ;;  %v677_v34 = vld [vmem:[%s1684_s7 + $0x84] sm:$0xf]  ;;  %v891_v23 = vrot.slane %v889_v15, 4 }
  0x64   : > { %1538 = vmatmul.msk.bf16.gmra.mxu1 %vm361_vm0, %v1577_v37  ;;  %v989_v37 = vunpack.c.l.b16 %v850_v25  ;;  %v948_v45 = vshrl.u32 %v677_v34, 16  ;;  %v951_v46 = vshll.u32 %v677_v34, 16 }
  0x65   : > { %v867_v43 = vrot.slane %v865_v33, 4  ;;  %v892_v29 = vor.u32 %v891_v23, %v887_v22  ;;  %v1594_v33 = vld [vmem:[%s1689_s10 + $0x60] sm:$0xff] }
  0x66   : > { %v1006_v49 = vpack.c.b16 %v989_v37, %v988_v36  ;;  %v950_v55 = vrot.slane %v948_v45, 4  ;;  %v953_v56 = vrot.slane %v951_v46, 5 }
  0x67   : > { %v868_v53 = vor.u32 %v867_v43, %v863_v42  ;;  %v893_v38 = vrot.slane %v892_v29, 4 }
  0x68   : > { %v954_v2 = vor.u32 %v953_v56, %v950_v55 }
  0x69   : > { %v869_v1 = vrot.slane %v868_v53, 4  ;;  %v898_v41 = vsel %vm1704_vm3, %v893_v38, %v897_v39 }
  0x6a   : > { %v955_v9 = vrot.slane %v954_v2, 4  ;;  %v993_v44 = vunpack.c.l.b16 %v898_v41 }
  0x6b   : > { %v874_v8 = vsel %vm1704_vm3, %v869_v1, %v873_v63 }
  0x6c   : > { %v991_v17 = vunpack.c.l.b16 %v874_v8  ;;  %v960_v18 = vsel %vm1704_vm3, %v955_v9, %v959_v57 }
  0x6d   : > { %v998_v25 = vunpack.c.l.b16 %v960_v18 }
  0x6e   : > { %v1007_v27 = vpack.c.b16 %v991_v17, %v990_v16 }
  0x6f   : > { %1562 = vmatmul.msk.bf16.gmra.mxu2 %vm361_vm0, %v1005_v12  ;;  %v876_v12 = vshrl.u32 %v668_v5, 16 }
  0x73   : > { %1566 = vmatmul.msk.bf16.vlgmr.msra.gmra.mxu3 %vm361_vm0, %v1009_v19  ;;  %1471 = vmatmul.msk.bf16.gmra.mxu0 %vm361_vm0, %v1592_v20  ;;  %v970_v19 = vsel %vm1704_vm3, %v965_v10, %v969_v11  ;;  %v878_v20 = vrot.slane %v876_v12, 4 }
  0x74   : > { %1539 = vmatmul.msk.bf16.gmra.mxu1 %vm361_vm0, %v1578_v21  ;;  %v881_v21 = vrot.slane %v879_v13, 5  ;;  %v999_v26 = vunpack.c.l.b16 %v970_v19 }
  0x76   : > { %v882_v28 = vor.u32 %v881_v21, %v878_v20  ;;  %v1011_v32 = vpack.c.b16 %v999_v26, %v998_v25 }
  0x78   : > { %v883_v37 = vrot.slane %v882_v28, 4 }
  0x7a   : > { %v888_v40 = vsel %vm1704_vm3, %v883_v37, %v887_v22 }
  0x7b   : > { %v992_v43 = vunpack.c.l.b16 %v888_v40 }
  0x7d   : > { %v1008_v47 = vpack.c.b16 %v993_v44, %v992_v43 }
  0x7f   : > { %1563 = vmatmul.msk.bf16.gmra.mxu2 %vm361_vm0, %v1006_v49 }
  0x83   : > { %1567 = vmatmul.msk.bf16.gmra.mxu3 %vm361_vm0, %v1010_v60  ;;  %1472 = vmatmul.msk.bf16.gmra.mxu0 %vm361_vm0, %v1593_v61 }
  0x84   : > { %1540 = vmatmul.msk.bf16.gmra.mxu1 %vm361_vm0, %v1579_v0 }
  0x8f   : > { %1564 = vmatmul.msk.bf16.gmra.mxu2 %vm361_vm0, %v1007_v27 }
  0x90   : > { %v407_v34 = vpop.f32.mrf.mxu0 }
  0x91   : > { %v584_v36 = vpop.f32.mrf.mxu1 }
  0x92   : > { %v585_v49 = vadd.f32 %v584_v36, %v407_v34 }
  0x93   : > { %1568 = vmatmul.msk.bf16.gmra.mxu3 %vm361_vm0, %v1011_v32  ;;  %1473 = vmatmul.msk.bf16.gmra.mxu0 %vm361_vm0, %v1594_v33 }
  0x94   : > { %1541 = vmatmul.msk.bf16.gmra.mxu1 %vm361_vm0, %v1580_v35 }
  0x96   : > { %v1840_v42 = vpop.f32.mrf.mxu3 }
  0x98   : > { %v409_v45 = vpop.f32.mrf.mxu0 }
  0x99   : > { %v586_v46 = vpop.f32.mrf.mxu1 }
  0x9a   : > { %v587_v60 = vadd.f32 %v586_v46, %v409_v45 }
  0x9e   : > { %v1842_v48 = vpop.f32.mrf.mxu3 }
  0x9f   : > { %1565 = vmatmul.msk.bf16.gmra.mxu2 %vm361_vm0, %v1008_v47 }
  0xa0   : > { %v412_v50 = vpop.f32.mrf.mxu0 }
  0xa1   : > { %v589_v51 = vpop.f32.mrf.mxu1 }
  0xa2   : > { %v1069_v52 = vpop.f32.mrf.mxu2  ;;  %v590_v4 = vadd.f32 %v589_v51, %v412_v50 }
  0xa3   : > { %v1129_v53 = vadd.f32 %v1069_v52, %v585_v49 }
  0xa5   : > { %v1155_v55 = vmul.f32 %v1848_v30, %v1129_v53 }
  0xa6   : > { %v1856_v56 = vpop.f32.mrf.mxu3 }
  0xa7   : > { %v1181_v57 = vadd.f32 %v1853_v54, %v1155_v55 }
  0xa8   : > { %v414_v58 = vpop.f32.mrf.mxu0 }
  0xa9   : > { %v591_v59 = vpop.f32.mrf.mxu1  ;;  %vm1205_vm4 = vcmp.ge.f32.partialorder %v1181_v57, 0.0  ;;  %v1229_v61 = vmul.f32 0.2, %v1181_v57 }
  0xaa   : > { %v1071_v62 = vpop.f32.mrf.mxu2  ;;  %v592_v18 = vadd.f32 %v591_v59, %v414_v58 }
  0xab   : > { %v1253_v63 = vsel %vm1205_vm4, %v1181_v57, %v1229_v61  ;;  %v1130_v0 = vadd.f32 %v1071_v62, %v587_v60 }
  0xac   : > { %v1277_v1 = vpack.c.bf16 %v1253_v63, %v1253_v63 }
  0xad   : > { %v1156_v2 = vmul.f32 %v1848_v30, %v1130_v0 }
  0xae   : > { %v1866_v3 = vpop.f32.mrf.mxu3  ;;  %1302 = vst.msk [vmem:[%s1863_s20] sm:$0xf] %vm1301_vm5, %v1277_v1 }
  0xaf   : > { %v1182_v5 = vadd.f32 %v1853_v54, %v1156_v2 }
  0xb0   : > { %v417_v6 = vpop.f32.mrf.mxu0 }
  0xb1   : > { %v594_v7 = vpop.f32.mrf.mxu1  ;;  %vm1206_vm6 = vcmp.ge.f32.partialorder %v1182_v5, 0.0  ;;  %v1230_v8 = vmul.f32 0.2, %v1182_v5 }
  0xb2   : > { %v1074_v9 = vpop.f32.mrf.mxu2  ;;  %v595_v26 = vadd.f32 %v594_v7, %v417_v6 }
  0xb3   : > { %v1254_v10 = vsel %vm1206_vm6, %v1182_v5, %v1230_v8  ;;  %v1131_v11 = vadd.f32 %v1074_v9, %v590_v4 }
  0xb4   : > { %v1278_v12 = vpack.c.bf16 %v1254_v10, %v1254_v10 }
  0xb5   : > { %v1157_v13 = vmul.f32 %v1848_v30, %v1131_v11 }
  0xb6   : > { %v1872_v14 = vpop.f32.mrf.mxu3  ;;  %1303 = vst.msk [vmem:[%s1863_s20 + $0x4] sm:$0xf] %vm1301_vm5, %v1278_v12 }
  0xb7   : > { %v1183_v15 = vadd.f32 %v1853_v54, %v1157_v13 }
  0xb8   : > { %v419_v16 = vpop.f32.mrf.mxu0 }
  0xb9   : > { %v596_v17 = vpop.f32.mrf.mxu1  ;;  %vm1207_vm7 = vcmp.ge.f32.partialorder %v1183_v15, 0.0  ;;  %v1231_v19 = vmul.f32 0.2, %v1183_v15 }
  0xba   : > { %v1076_v20 = vpop.f32.mrf.mxu2  ;;  %v597_v41 = vadd.f32 %v596_v17, %v419_v16 }
  0xbb   : > { %v1255_v21 = vsel %vm1207_vm7, %v1183_v15, %v1231_v19  ;;  %v1132_v22 = vadd.f32 %v1076_v20, %v592_v18 }
  0xbc   : > { %v1279_v23 = vpack.c.bf16 %v1255_v21, %v1255_v21 }
  0xbd   : > { %v1158_v24 = vmul.f32 %v1848_v30, %v1132_v22 }
  0xbe   : > { %v1878_v25 = vpop.f32.mrf.mxu3  ;;  %1304 = vst.msk [vmem:[%s1863_s20 + $0x8] sm:$0xf] %vm1301_vm5, %v1279_v23 }
  0xbf   : > { %v1184_v27 = vadd.f32 %v1853_v54, %v1158_v24 }
  0xc0   : > { %v422_v28 = vpop.f32.mrf.mxu0 }
  0xc1   : > { %v599_v29 = vpop.f32.mrf.mxu1  ;;  %vm1208_vm8 = vcmp.ge.f32.partialorder %v1184_v27, 0.0  ;;  %v1232_v31 = vmul.f32 0.2, %v1184_v27 }
  0xc2   : > { %v1079_v32 = vpop.f32.mrf.mxu2  ;;  %v600_v51 = vadd.f32 %v599_v29, %v422_v28 }
  0xc3   : > { %v1256_v33 = vsel %vm1208_vm8, %v1184_v27, %v1232_v31  ;;  %v1133_v34 = vadd.f32 %v1079_v32, %v595_v26 }
  0xc4   : > { %v1280_v35 = vpack.c.bf16 %v1256_v33, %v1256_v33 }
  0xc5   : > { %v1159_v36 = vmul.f32 %v1848_v30, %v1133_v34 }
  0xc6   : > { %v1884_v37 = vpop.f32.mrf.mxu3  ;;  %1305 = vst.msk [vmem:[%s1863_s20 + $0xc] sm:$0xf] %vm1301_vm5, %v1280_v35 }
  0xc7   : > { %v1185_v38 = vadd.f32 %v1853_v54, %v1159_v36 }
  0xc8   : > { %v424_v39 = vpop.f32.mrf.mxu0 }
  0xc9   : > { %v601_v40 = vpop.f32.mrf.mxu1  ;;  %vm1209_vm9 = vcmp.ge.f32.partialorder %v1185_v38, 0.0  ;;  %v1233_v43 = vmul.f32 0.2, %v1185_v38 }
  0xca   : > { %v1081_v44 = vpop.f32.mrf.mxu2  ;;  %v602_v4 = vadd.f32 %v601_v40, %v424_v39 }
  0xcb   : > { %v1257_v45 = vsel %vm1209_vm9, %v1185_v38, %v1233_v43  ;;  %v1134_v46 = vadd.f32 %v1081_v44, %v597_v41 }
  0xcc   : > { %v1281_v47 = vpack.c.bf16 %v1257_v45, %v1257_v45 }
  0xcd   : > { %v1160_v49 = vmul.f32 %v1848_v30, %v1134_v46  ;;  %v630_v46 = vadd.f32 %v1884_v37, %v1840_v42 }
  0xce   : > { %v1890_v50 = vpop.f32.mrf.mxu3  ;;  %1306 = vst.msk [vmem:[%s1863_s20 + $0x10] sm:$0xf] %vm1301_vm5, %v1281_v47 }
  0xcf   : > { %v1186_v52 = vadd.f32 %v1853_v54, %v1160_v49 }
  0xd0   : > { %v427_v53 = vpop.f32.mrf.mxu0 }
  0xd1   : > { %v604_v55 = vpop.f32.mrf.mxu1  ;;  %vm1210_vm10 = vcmp.ge.f32.partialorder %v1186_v52, 0.0  ;;  %v1234_v57 = vmul.f32 0.2, %v1186_v52 }
  0xd2   : > { %v1084_v58 = vpop.f32.mrf.mxu2  ;;  %v605_v12 = vadd.f32 %v604_v55, %v427_v53 }
  0xd3   : > { %v1258_v59 = vsel %vm1210_vm10, %v1186_v52, %v1234_v57  ;;  %v1135_v60 = vadd.f32 %v1084_v58, %v600_v51 }
  0xd4   : > { %v1282_v61 = vpack.c.bf16 %v1258_v59, %v1258_v59 }
  0xd5   : > { %v1161_v62 = vmul.f32 %v1848_v30, %v1135_v60 }
  0xd6   : > { %v1896_v63 = vpop.f32.mrf.mxu3  ;;  %1307 = vst.msk [vmem:[%s1863_s20 + $0x14] sm:$0xf] %vm1301_vm5, %v1282_v61 }
  0xd7   : > { %v1187_v0 = vadd.f32 %v1853_v54, %v1161_v62  ;;  %v632_v62 = vadd.f32 %v1890_v50, %v1842_v48 }
  0xd8   : > { %v429_v1 = vpop.f32.mrf.mxu0 }
  0xd9   : > { %v606_v2 = vpop.f32.mrf.mxu1  ;;  %vm1211_vm11 = vcmp.ge.f32.partialorder %v1187_v0, 0.0  ;;  %v1235_v5 = vmul.f32 0.2, %v1187_v0 }
  0xda   : > { %v1086_v6 = vpop.f32.mrf.mxu2  ;;  %v607_v26 = vadd.f32 %v606_v2, %v429_v1 }
  0xdb   : > { %v1259_v7 = vsel %vm1211_vm11, %v1187_v0, %v1235_v5  ;;  %v1136_v8 = vadd.f32 %v1086_v6, %v602_v4 }
  0xdc   : > { %v1283_v9 = vpack.c.bf16 %v1259_v7, %v1259_v7 }
  0xdd   : > { %v1162_v10 = vmul.f32 %v1848_v30, %v1136_v8 }
  0xde   : > { %v1902_v11 = vpop.f32.mrf.mxu3  ;;  %1308 = vst.msk [vmem:[%s1863_s20 + $0x18] sm:$0xf] %vm1301_vm5, %v1283_v9 }
  0xdf   : > { %v1188_v13 = vadd.f32 %v1853_v54, %v1162_v10 }
  0xe0   : > { %v432_v15 = vpop.f32.mrf.mxu0 }
  0xe1   : > { %v609_v16 = vpop.f32.mrf.mxu1  ;;  %vm1212_vm12 = vcmp.ge.f32.partialorder %v1188_v13, 0.0  ;;  %v1236_v17 = vmul.f32 0.2, %v1188_v13 }
  0xe2   : > { %v1089_v18 = vpop.f32.mrf.mxu2  ;;  %v610_v38 = vadd.f32 %v609_v16, %v432_v15 }
  0xe3   : > { %v1260_v19 = vsel %vm1212_vm12, %v1188_v13, %v1236_v17  ;;  %v1137_v20 = vadd.f32 %v1089_v18, %v605_v12  ;;  %v635_v18 = vadd.f32 %v1896_v63, %v1856_v56 }
  0xe4   : > { %v1284_v21 = vpack.c.bf16 %v1260_v19, %v1260_v19 }
  0xe5   : > { %v1163_v22 = vmul.f32 %v1848_v30, %v1137_v20 }
  0xe6   : > { %v1908_v23 = vpop.f32.mrf.mxu3  ;;  %1309 = vst.msk [vmem:[%s1863_s20 + $0x1c] sm:$0xf] %vm1301_vm5, %v1284_v21 }
  0xe7   : > { %v1189_v24 = vadd.f32 %v1853_v54, %v1163_v22 }
  0xe8   : > { %v434_v28 = vpop.f32.mrf.mxu0 }
  0xe9   : > { %vm1213_vm13 = vcmp.ge.f32.partialorder %v1189_v24, 0.0  ;;  %v1237_v27 = vmul.f32 0.2, %v1189_v24  ;;  %v611_v31 = vpop.f32.mrf.mxu1 }
  0xea   : > { %v1091_v29 = vpop.f32.mrf.mxu2  ;;  %v612_v58 = vadd.f32 %v611_v31, %v434_v28 }
  0xeb   : > { %v1261_v32 = vsel %vm1213_vm13, %v1189_v24, %v1237_v27  ;;  %v1138_v33 = vadd.f32 %v1091_v29, %v607_v26 }
  0xec   : > { %v1285_v34 = vpack.c.bf16 %v1261_v32, %v1261_v32 }
  0xed   : > { %v1164_v35 = vmul.f32 %v1848_v30, %v1138_v33 }
  0xee   : > { %v1914_v36 = vpop.f32.mrf.mxu3  ;;  %1310 = vst.msk [vmem:[%s1863_s20 + $0x20] sm:$0xf] %vm1301_vm5, %v1285_v34 }
  0xef   : > { %v1190_v39 = vadd.f32 %v1853_v54, %v1164_v35 }
  0xf0   : > { %v437_v45 = vpop.f32.mrf.mxu0 }
  0xf1   : > { %vm1214_vm14 = vcmp.ge.f32.partialorder %v1190_v39, 0.0  ;;  %v1238_v40 = vmul.f32 0.2, %v1190_v39  ;;  %v614_v49 = vpop.f32.mrf.mxu1 }
  0xf2   : > { %v1094_v41 = vpop.f32.mrf.mxu2  ;;  %v615_v10 = vadd.f32 %v614_v49, %v437_v45 }
  0xf3   : > { %v1262_v43 = vsel %vm1214_vm14, %v1190_v39, %v1238_v40  ;;  %v1139_v44 = vadd.f32 %v1094_v41, %v610_v38  ;;  %v637_v39 = vadd.f32 %v1902_v11, %v1866_v3 }
  0xf4   : > { %v1286_v47 = vpack.c.bf16 %v1262_v43, %v1262_v43 }
  0xf5   : > { %v1165_v51 = vmul.f32 %v1848_v30, %v1139_v44 }
  0xf6   : > { %v1114_v52 = vpop.f32.mrf.mxu3  ;;  %1311 = vst.msk [vmem:[%s1863_s20 + $0x24] sm:$0xf] %vm1301_vm5, %v1286_v47 }
  0xf7   : > { %v1147_v53 = vadd.f32 %v1114_v52, %v630_v46  ;;  %v1191_v55 = vadd.f32 %v1853_v54, %v1165_v51 }
  0xf8   : > { %v439_v5 = vpop.f32.mrf.mxu0 }
  0xf9   : > { %v1173_v57 = vmul.f32 %v1848_v30, %v1147_v53  ;;  %vm1215_vm15 = vcmp.ge.f32.partialorder %v1191_v55, 0.0  ;;  %v1239_v59 = vmul.f32 0.2, %v1191_v55  ;;  %v616_v8 = vpop.f32.mrf.mxu1 }
  0xfa   : > { %v1096_v61 = vpop.f32.mrf.mxu2  ;;  %v617_v56 = vadd.f32 %v616_v8, %v439_v5 }
  0xfb   : > { %v1199_v60 = vadd.f32 %v1853_v54, %v1173_v57  ;;  %v1263_v42 = vsel %vm1215_vm15, %v1191_v55, %v1239_v59  ;;  %v1140_v37 = vadd.f32 %v1096_v61, %v612_v58 }
  0xfc   : > { %v1287_v0 = vpack.c.bf16 %v1263_v42, %v1263_v42 }
  0xfd   : > { %vm1223_vm0 = vcmp.ge.f32.partialorder %v1199_v60, 0.0  ;;  %v1247_v1 = vmul.f32 0.2, %v1199_v60  ;;  %v1166_v2 = vmul.f32 %v1848_v30, %v1140_v37 }
  0xfe   : > { %v1116_v4 = vpop.f32.mrf.mxu3  ;;  %1312 = vst.msk [vmem:[%s1863_s20 + $0x28] sm:$0xf] %vm1301_vm5, %v1287_v0 }
  0xff   : > { %v1271_v6 = vsel %vm1223_vm0, %v1199_v60, %v1247_v1  ;;  %v1148_v7 = vadd.f32 %v1116_v4, %v632_v62  ;;  %v1192_v12 = vadd.f32 %v1853_v54, %v1166_v2  ;;  %v640_v60 = vadd.f32 %v1908_v23, %v1872_v14 }
 0x100   : > { %v1295_v9 = vpack.c.bf16 %v1271_v6, %v1271_v6  ;;  %v442_v29 = vpop.f32.mrf.mxu0 }
 0x101   : > { %v1174_v13 = vmul.f32 %v1848_v30, %v1148_v7  ;;  %vm1216_vm1 = vcmp.ge.f32.partialorder %v1192_v12, 0.0  ;;  %v1240_v48 = vmul.f32 0.2, %v1192_v12  ;;  %v619_v32 = vpop.f32.mrf.mxu1 }
 0x102   : > { %1320 = vst.msk [vmem:[%s1863_s20 + $0x48] sm:$0xf] %vm1301_vm5, %v1295_v9  ;;  %v1099_v15 = vpop.f32.mrf.mxu2  ;;  %v620_v49 = vadd.f32 %v619_v32, %v442_v29 }
 0x103   : > { %v1200_v50 = vadd.f32 %v1853_v54, %v1174_v13  ;;  %v1264_v16 = vsel %vm1216_vm1, %v1192_v12, %v1240_v48  ;;  %v1141_v17 = vadd.f32 %v1099_v15, %v615_v10  ;;  %v642_v10 = vadd.f32 %v1914_v36, %v1878_v25 }
 0x104   : > { %v1288_v19 = vpack.c.bf16 %v1264_v16, %v1264_v16 }
 0x105   : > { %vm1224_vm2 = vcmp.ge.f32.partialorder %v1200_v50, 0.0  ;;  %v1248_v20 = vmul.f32 0.2, %v1200_v50  ;;  %v1167_v21 = vmul.f32 %v1848_v30, %v1141_v17 }
 0x106   : > { %v1119_v22 = vpop.f32.mrf.mxu3  ;;  %1313 = vst.msk [vmem:[%s1863_s20 + $0x2c] sm:$0xf] %vm1301_vm5, %v1288_v19 }
 0x107   : > { %v1272_v24 = vsel %vm1224_vm2, %v1200_v50, %v1248_v20  ;;  %v1149_v26 = vadd.f32 %v1119_v22, %v635_v18  ;;  %v1193_v28 = vadd.f32 %v1853_v54, %v1167_v21 }
 0x108   : > { %v1296_v27 = vpack.c.bf16 %v1272_v24, %v1272_v24  ;;  %v444_v11 = vpop.f32.mrf.mxu0 }
 0x109   : > { %v1175_v31 = vmul.f32 %v1848_v30, %v1149_v26  ;;  %vm1217_vm3 = vcmp.ge.f32.partialorder %v1193_v28, 0.0  ;;  %v1241_v63 = vmul.f32 0.2, %v1193_v28  ;;  %v621_v55 = vpop.f32.mrf.mxu1 }
 0x10a   : > { %1321 = vst.msk [vmem:[%s1863_s20 + $0x4c] sm:$0xf] %vm1301_vm5, %v1296_v27  ;;  %v1101_v34 = vpop.f32.mrf.mxu2  ;;  %v622_v6 = vadd.f32 %v621_v55, %v444_v11 }
 0x10b   : > { %v1201_v33 = vadd.f32 %v1853_v54, %v1175_v31  ;;  %v1265_v35 = vsel %vm1217_vm3, %v1193_v28, %v1241_v63  ;;  %v1142_v38 = vadd.f32 %v1101_v34, %v617_v56 }
 0x10c   : > { %v1289_v40 = vpack.c.bf16 %v1265_v35, %v1265_v35 }
 0x10d   : > { %vm1225_vm4 = vcmp.ge.f32.partialorder %v1201_v33, 0.0  ;;  %v1249_v41 = vmul.f32 0.2, %v1201_v33  ;;  %v1168_v43 = vmul.f32 %v1848_v30, %v1142_v38 }
 0x10e   : > { %v1121_v44 = vpop.f32.mrf.mxu3  ;;  %1314 = vst.msk [vmem:[%s1863_s20 + $0x30] sm:$0xf] %vm1301_vm5, %v1289_v40 }
 0x10f   : > { %v1273_v45 = vsel %vm1225_vm4, %v1201_v33, %v1249_v41  ;;  %v1150_v46 = vadd.f32 %v1121_v44, %v637_v39  ;;  %v1194_v51 = vadd.f32 %v1853_v54, %v1168_v43 }
 0x110   : > { %v1297_v47 = vpack.c.bf16 %v1273_v45, %v1273_v45  ;;  %v447_v48 = vpop.f32.mrf.mxu0 }
 0x111   : > { %v1176_v52 = vmul.f32 %v1848_v30, %v1150_v46  ;;  %vm1218_vm6 = vcmp.ge.f32.partialorder %v1194_v51, 0.0  ;;  %v1242_v3 = vmul.f32 0.2, %v1194_v51  ;;  %v624_v50 = vpop.f32.mrf.mxu1 }
 0x112   : > { %1322 = vst.msk [vmem:[%s1863_s20 + $0x50] sm:$0xf] %vm1301_vm5, %v1297_v47  ;;  %v1104_v57 = vpop.f32.mrf.mxu2  ;;  %v625_v20 = vadd.f32 %v624_v50, %v447_v48 }
 0x113   : > { %v1202_v53 = vadd.f32 %v1853_v54, %v1176_v52  ;;  %v1266_v58 = vsel %vm1218_vm6, %v1194_v51, %v1242_v3  ;;  %v1143_v59 = vadd.f32 %v1104_v57, %v620_v49 }
 0x114   : > { %v1290_v61 = vpack.c.bf16 %v1266_v58, %v1266_v58 }
 0x115   : > { %vm1226_vm7 = vcmp.ge.f32.partialorder %v1202_v53, 0.0  ;;  %v1250_v42 = vmul.f32 0.2, %v1202_v53  ;;  %v1169_v37 = vmul.f32 %v1848_v30, %v1143_v59 }
 0x116   : > { %v1124_v62 = vpop.f32.mrf.mxu3  ;;  %1315 = vst.msk [vmem:[%s1863_s20 + $0x34] sm:$0xf] %vm1301_vm5, %v1290_v61 }
 0x117   : > { %v1274_v0 = vsel %vm1226_vm7, %v1202_v53, %v1250_v42  ;;  %v1151_v1 = vadd.f32 %v1124_v62, %v640_v60  ;;  %v1195_v4 = vadd.f32 %v1853_v54, %v1169_v37 }
 0x118   : > { %v1298_v2 = vpack.c.bf16 %v1274_v0, %v1274_v0  ;;  %v449_v56 = vpop.f32.mrf.mxu0 }
 0x119   : > { %v1177_v5 = vmul.f32 %v1848_v30, %v1151_v1  ;;  %vm1219_vm8 = vcmp.ge.f32.partialorder %v1195_v4, 0.0  ;;  %v1243_v14 = vmul.f32 0.2, %v1195_v4  ;;  %v626_v63 = vpop.f32.mrf.mxu1 }
 0x11a   : > { %1323 = vst.msk [vmem:[%s1863_s20 + $0x54] sm:$0xf] %vm1301_vm5, %v1298_v2  ;;  %v1106_v7 = vpop.f32.mrf.mxu2  ;;  %v627_v35 = vadd.f32 %v626_v63, %v449_v56 }
 0x11b   : > { %v1203_v23 = vadd.f32 %v1853_v54, %v1177_v5  ;;  %v1267_v8 = vsel %vm1219_vm8, %v1195_v4, %v1243_v14  ;;  %v1144_v9 = vadd.f32 %v1106_v7, %v622_v6 }
 0x11c   : > { %v1291_v12 = vpack.c.bf16 %v1267_v8, %v1267_v8 }
 0x11d   : > { %vm1227_vm9 = vcmp.ge.f32.partialorder %v1203_v23, 0.0  ;;  %v1251_v13 = vmul.f32 0.2, %v1203_v23  ;;  %v1170_v15 = vmul.f32 %v1848_v30, %v1144_v9 }
 0x11e   : > { %v1126_v16 = vpop.f32.mrf.mxu3  ;;  %1316 = vst.msk [vmem:[%s1863_s20 + $0x38] sm:$0xf] %vm1301_vm5, %v1291_v12 }
 0x11f   : > { %v1275_v17 = vsel %vm1227_vm9, %v1203_v23, %v1251_v13  ;;  %v1152_v18 = vadd.f32 %v1126_v16, %v642_v10  ;;  %v1196_v21 = vadd.f32 %v1853_v54, %v1170_v15 }
 0x120   : > { %v1299_v19 = vpack.c.bf16 %v1275_v17, %v1275_v17 }
 0x121   : > { %v1178_v22 = vmul.f32 %v1848_v30, %v1152_v18  ;;  %vm1220_vm10 = vcmp.ge.f32.partialorder %v1196_v21, 0.0  ;;  %v1244_v25 = vmul.f32 0.2, %v1196_v21 }
 0x122   : > { %1324 = vst.msk [vmem:[%s1863_s20 + $0x58] sm:$0xf] %vm1301_vm5, %v1299_v19  ;;  %v1109_v24 = vpop.f32.mrf.mxu2 }
 0x123   : > { %v1204_v36 = vadd.f32 %v1853_v54, %v1178_v22  ;;  %v1268_v26 = vsel %vm1220_vm10, %v1196_v21, %v1244_v25  ;;  %v1145_v27 = vadd.f32 %v1109_v24, %v625_v20 }
 0x124   : > { %v1292_v28 = vpack.c.bf16 %v1268_v26, %v1268_v26 }
 0x125   : > { %vm1228_vm11 = vcmp.ge.f32.partialorder %v1204_v36, 0.0  ;;  %v1252_v29 = vmul.f32 0.2, %v1204_v36  ;;  %v1171_v31 = vmul.f32 %v1848_v30, %v1145_v27 }
 0x126   : > { %1317 = vst.msk [vmem:[%s1863_s20 + $0x3c] sm:$0xf] %vm1301_vm5, %v1292_v28 }
 0x127   : > { %v1276_v32 = vsel %vm1228_vm11, %v1204_v36, %v1252_v29  ;;  %v1197_v34 = vadd.f32 %v1853_v54, %v1171_v31 }
 0x128   : > { %v1300_v33 = vpack.c.bf16 %v1276_v32, %v1276_v32 }
 0x129   : > { %vm1221_vm12 = vcmp.ge.f32.partialorder %v1197_v34, 0.0  ;;  %v1245_v38 = vmul.f32 0.2, %v1197_v34 }
 0x12a   : > { %1325 = vst.msk [vmem:[%s1863_s20 + $0x5c] sm:$0xf] %vm1301_vm5, %v1300_v33  ;;  %v1111_v39 = vpop.f32.mrf.mxu2 }
 0x12b   : > { %v1269_v40 = vsel %vm1221_vm12, %v1197_v34, %v1245_v38  ;;  %v1146_v41 = vadd.f32 %v1111_v39, %v627_v35 }
 0x12c   : > { %v1293_v43 = vpack.c.bf16 %v1269_v40, %v1269_v40 }
 0x12d   : > { %v1172_v44 = vmul.f32 %v1848_v30, %v1146_v41 }
 0x12e   : > { %1318 = vst.msk [vmem:[%s1863_s20 + $0x40] sm:$0xf] %vm1301_vm5, %v1293_v43 }
 0x12f   : > { %v1198_v45 = vadd.f32 %v1853_v54, %v1172_v44 }
 0x131   : > { %vm1222_vm13 = vcmp.ge.f32.partialorder %v1198_v45, 0.0  ;;  %v1246_v46 = vmul.f32 0.2, %v1198_v45 }
 0x133   : > { %v1270_v47 = vsel %vm1222_vm13, %v1198_v45, %v1246_v46 }
 0x134   : > { %v1294_v49 = vpack.c.bf16 %v1270_v47, %v1270_v47 }
 0x136   : > { %1319 = vst.msk [vmem:[%s1863_s20 + $0x44] sm:$0xf] %vm1301_vm5, %v1294_v49 }
 0x137 PF: > { %s14_s15 = sadd.s32 1, %s1625_s15  }
 0x138   : > { %p11_p4 = scmp.ge.s32.totalorder %s14_s15, 4  }
 0x13a   :  { %13 = sbr.rel (!%p11_p4) target bundleno = 1 (0x1), region = 71 }

// kernel: en_down_conv_fwd.3
= control target key start
LH: loop header
LB: loop body
LE: loop exit
PB: predicated region body
PF: predicated region fallthrough
CT: control target
= control target key end

     0   :  { %8 = vsyncpa [#allocation3], 0  ;;  %s2803_s0 = inlined_call_operand.vmem [shape: bf16[32,18,64], index: 0, kind: input, shape index: {}]   ;;  %s2804_s1 = inlined_call_operand.vmem [shape: bf16[3,64,64], index: 1, kind: input, shape index: {}]   ;;  %s2805_s2 = inlined_call_operand.vmem [shape: f32[2,64], index: 2, kind: input, shape index: {}]   ;;  %s2806_s3 = inlined_call_operand.hbm [shape: f32[32,16,64], index: 3, kind: output, shape index: {}]  }
   0x1   :  { %10 = vsyncpa [#allocation3 + $0x1], 0  ;;  %s2144_s12 = smov 0   ;;  %s2146_s13 = smov 0  }
   0x2   :  { %s2148_s14 = smov 0   ;;  %s2150_s15 = smov 0  }
   0x3 LB: > { %s2165_s16 = sadd.s32 4294967295, %s2120_s15   ;;  %s1767_s17 = sadd.s32 4294967294, %s2120_s15   ;;  %s2120_s15 = sphi %s2150_s15, %s2816_s15   ;;  %s2116_s14 = sphi %s2148_s14, %s2815_s14   ;;  %s2112_s13 = sphi %s2146_s13, %s2814_s13   ;;  %s2108_s12 = sphi %s2144_s12, %s2813_s12  }
   0x4   : > { %s2169_s18 = sadd.s32 1, %s2120_s15   ;;  %s91_s19 = sadd.s32 1, %s2116_s14 }
   0x5   : > { %s88_s20 = ssub.s32 %s2120_s15, %s2169_s18  ;;  %p101_p0 = scmp.ne.s32.totalorder %s2116_s14, %s2112_s13 }
   0x6   : > { %p89_p1 = scmp.eq.s32.totalorder %s88_s20, 0  ;;  %p102_p2 = scmp.eq.s32.totalorder %s2165_s16, 1 }
   0x7   : > { %p107_p3 = scmp.ne.s32.totalorder %s2112_s13, %s2108_s12  ;;  %p108_p4 = scmp.eq.s32.totalorder %s1767_s17, 1 }
   0x8   : > { %s2180_s21 = scalar_select %p89_p1, %s2116_s14, %s91_s19  }
   0x9   : > { %p2182_p5 = por %p102_p2, %p101_p0  ;;  %p2186_p6 = por %p108_p4, %p107_p3 }
   0xa   : > { %p1770_p7 = scmp.ge.s32.totalorder %s2120_s15, 1  ;;  %p142_p8 = scmp.lt.s32.totalorder %s2120_s15, 3 }
   0xc   : > { %p143_p9 = pnand %p1770_p7, %p142_p8 }
   0xd   : > { %s1772_s30 = sshll.u32 (!%p143_p9), %s2165_s16, 4  ;;  %s2001_s24 = sshll.u32 (!%p143_p9), %s2165_s16, 8 }
   0xe   : > { %146 = sbr.rel (%p143_p9) target bundleno = 372 (0x174), region = 32  ;;  %p168_p10 = scmp.lt.s32.totalorder (!%p143_p9), %s1772_s30, 31 }
   0xf   : > { %s1701_s27 = scalar_lea.hbm (!%p143_p9), %s2806_s3, %s2001_s24  ;;  %s2078_s7 = scalar_lea.hbm (!%p143_p9), %s2806_s3, 512 }
  0x13   : > { %v2195_v0 = vld [vmem:[%s2804_s1 + $0x18] sm:$0xff]  ;;  %v2211_v3 = vld [vmem:[%s2804_s1 + $0x10] sm:$0xff]  ;;  %s2818_s30 = smov (!%p168_p10, %s1772_s30), 31  ;;  %v2226_v6 = vld [vmem:[%s2804_s1 + $0x8] sm:$0xff]  ;;  %vm1127_vm0 = vcmask 1042432   ;;  %vm1128_vm1 = vcmask 1046532  }
  0x14   : > { %v2200_v1 = vld [vmem:[%s2804_s1 + $0x58] sm:$0xff]  ;;  %994 = vmatpush.bf16.msra.mxu1 %v2195_v0  ;;  %v2216_v4 = vld [vmem:[%s2804_s1 + $0x50] sm:$0xff]  ;;  %s2014_s10 = smul.u32 12, %s2818_s30  ;;  %v2231_v7 = vld [vmem:[%s2804_s1 + $0x48] sm:$0xff]  ;;  %vm700_vm2 = vcmask 523264  }
  0x15   : > { %v1995_v2 = vld [vmem:[%s2804_s1 + $0x38] sm:$0xff]  ;;  %1375 = vmatpush.bf16.msra.mxu2 %v2200_v1  ;;  %v1994_v5 = vld [vmem:[%s2804_s1 + $0x30] sm:$0xff]  ;;  %v1993_v8 = vld [vmem:[%s2804_s1 + $0x28] sm:$0xff]  ;;  %vm232_vm3 = vsmask.f32 3328 }
  0x16   : > { %753 = vmatpush.bf16.msra.mxu0 %v1995_v2  ;;  %2002 = vmatpush.bf16.msra.mxu3 %v1995_v2  ;;  %s2239_s28 = scalar_lea.vmem %s2803_s0, %s2014_s10  ;;  %v2244_v9 = vld [vmem:[%s2804_s1] sm:$0xff]  ;;  %vm233_vm4 = vsmask.f32 7440  ;;  %vm2254_vm5 = vmor %vm1127_vm0, %vm1128_vm1  ;;  %s164_s10 = sand.u32 1, %s2112_s13  }
  0x17   : > { %v2249_v10 = vld [vmem:[%s2804_s1 + $0x40] sm:$0xff]  ;;  %v216_v12 = vld [vmem:[%s2239_s28 + $0x8] sm:$0x1]  ;;  %v200_v23 = vld [vmem:[%s2239_s28 + $0x90] sm:$0xf]  ;;  %s2524_s19 = sshll.u32 %s164_s10, 8 }
  0x18   : > { %995 = vmatpush.bf16.msra.mxu1 %v2211_v3  ;;  %v177_v11 = vld [vmem:[%s2239_s28 + $0x4] sm:$0xf]  ;;  %v1079_v13 = vld [vmem:[%s2239_s28] sm:$0xe]  ;;  %v1135_v16 = vrot.slane %v216_v12, 5  ;;  %v255_v26 = vshll.u32 %v216_v12, 16  ;;  %vm2280_vm6 = vmor %vm232_vm3, %vm233_vm4 }
  0x19   : > { %1376 = vmatpush.bf16.msra.mxu2 %v2216_v4  ;;  %v1132_v15 = vrot.slane %v177_v11, 5  ;;  %v1992_v17 = vld [vmem:[%s2804_s1 + $0x20] sm:$0xff]  ;;  %v1910_v19 = vrot.slane %v1079_v13, 9  ;;  %v245_v22 = vshll.u32 %v177_v11, 16  ;;  %v249_v25 = vshrl.u32 %v177_v11, 16  ;;  %s2545_s20 = scalar_lea.vmem [#allocation2], %s2524_s19 }
  0x1a   : > { %754 = vmatpush.bf16.msra.mxu0 %v1994_v5  ;;  %2003 = vmatpush.bf16.msra.mxu3 %v1994_v5  ;;  %v176_v18 = vld [vmem:[%s2239_s28] sm:$0xf]  ;;  %v2266_v27 = vld [vmem:[%s2239_s28 + $0x94] sm:$0xf]  ;;  %v524_v28 = vshrl.u32 %v200_v23, 16  ;;  %v257_v38 = vrot.slane %v255_v26, 5 }
  0x1b   : > { %v236_v20 = vshrl.u32 %v176_v18, 16  ;;  %v239_v21 = vshll.u32 %v176_v18, 16  ;;  %v1134_v24 = vrot.slane %v1132_v15, 4  ;;  %v1133_v29 = vsel %vm2254_vm5, %v1910_v19, %v1132_v15  ;;  %v2271_v33 = vld [vmem:[%s2239_s28 + $0x98] sm:$0x1]  ;;  %v1972_v34 = vld [vmem:[%s2239_s28] sm:$0xff] }
  0x1c   : > { %996 = vmatpush.bf16.msra.mxu1 %v2226_v6  ;;  %v247_v32 = vrot.slane %v245_v22, 5  ;;  %v1251_v36 = vunpack.c.l.b16 %v1133_v29  ;;  %v251_v37 = vrot.slane %v249_v25, 4  ;;  %v526_v41 = vrot.slane %v524_v28, 4  ;;  %v179_v51 = vld [vmem:[%s2239_s28 + $0x10] sm:$0xf]  ;;  %s1702_s16 = sshll.u32 %s2545_s20, 4  ;;  %s1703_s16 = int_to_ptr.vmem [resolvable:$true] %s1702_s16 }
  0x1d   : > { %1377 = vmatpush.bf16.msra.mxu2 %v2231_v7  ;;  %v238_v30 = vrot.slane %v236_v20, 4  ;;  %v241_v31 = vrot.slane %v239_v21, 5  ;;  %v1136_v35 = vsel %vm2254_vm5, %v1134_v24, %v1135_v16  ;;  %v527_v42 = vshll.u32 %v200_v23, 16  ;;  %v1080_v52 = vld [vmem:[%s2239_s28 + $0xc] sm:$0xe]  ;;  %s1689_s29 = scalar_lea.sflag [#allocation3], %s164_s10 }
  0x1e   : > { %755 = vmatpush.bf16.msra.mxu0 %v1993_v8  ;;  %2004 = vmatpush.bf16.msra.mxu3 %v1993_v8  ;;  %v1252_v39 = vunpack.c.l.b16 %v1136_v35  ;;  %v252_v44 = vor.u32 %v251_v37, %v247_v32  ;;  %v533_v45 = vshll.u32 %v2266_v27, 16  ;;  %v537_v46 = vshrl.u32 %v2266_v27, 16  ;;  %v217_v56 = vld [vmem:[%s2239_s28 + $0x14] sm:$0x1]  ;;  %v178_v60 = vld [vmem:[%s2239_s28 + $0xc] sm:$0xf] }
  0x1f   : > { %v242_v40 = vor.u32 %v241_v31, %v238_v30  ;;  %v543_v47 = vshll.u32 %v2271_v33, 16  ;;  %v529_v50 = vrot.slane %v527_v42, 5  ;;  %v1139_v8 = vrot.slane %v179_v51, 5  ;;  %v202_v21 = vld [vmem:[%s2239_s28 + $0x9c] sm:$0xf] }
  0x20   : > { %997 = vmatpush.bf16.msra.mxu1 %v2244_v9  ;;  %v1283_v48 = vpack.c.b16 %v1252_v39, %v1251_v36  ;;  %v253_v53 = vrot.slane %v252_v44, 4  ;;  %v535_v54 = vrot.slane %v533_v45, 5  ;;  %v539_v55 = vrot.slane %v537_v46, 4  ;;  %v2307_v25 = vld [vmem:[%s2239_s28 + $0xa0] sm:$0xf] }
  0x21   : > { %1378 = vmatpush.bf16.msra.mxu2 %v2249_v10  ;;  %v243_v49 = vrot.slane %v242_v40, 4  ;;  %v530_v58 = vor.u32 %v529_v50, %v526_v41  ;;  %v545_v59 = vrot.slane %v543_v47, 5  ;;  %v1142_v11 = vrot.slane %v217_v56, 5  ;;  %v181_v41 = vld [vmem:[%s2239_s28 + $0x1c] sm:$0xf]  ;;  %v1973_v50 = vld [vmem:[%s2239_s28 + $0xc] sm:$0xff] }
  0x22   : > { %756 = vmatpush.bf16.msra.mxu0 %v1992_v17  ;;  %2005 = vmatpush.bf16.msra.mxu3 %v1992_v17  ;;  %v258_v61 = vsel %vm2280_vm6, %v253_v53, %v257_v38  ;;  %v540_v63 = vor.u32 %v539_v55, %v535_v54  ;;  %v260_v13 = vshrl.u32 %v178_v60, 16  ;;  %v263_v15 = vshll.u32 %v178_v60, 16  ;;  %v2314_v38 = vld [vmem:[%s2239_s28 + $0xa4] sm:$0x1]  ;;  %v218_v45 = vld [vmem:[%s2239_s28 + $0x20] sm:$0x1] }
  0x23   : > { %1894 = vmatmul.msk.bf16.vlgmr.msra.gmra.mxu1 %vm700_vm2, %v1972_v34  ;;  %v248_v57 = vsel %vm2280_vm6, %v243_v49, %v247_v32  ;;  %v629_v2 = vunpack.c.l.b16 %v258_v61  ;;  %v531_v5 = vrot.slane %v530_v58, 4  ;;  %v269_v16 = vshll.u32 %v179_v51, 16  ;;  %v1081_v49 = vld [vmem:[%s2239_s28 + $0x18] sm:$0xe] }
  0x24   : > { %1950 = vmatmul.msk.bf16.vlgmr.msra.gmra.mxu2 %vm700_vm2, %v1283_v48  ;;  %v628_v62 = vunpack.c.l.b16 %v248_v57  ;;  %v541_v12 = vrot.slane %v540_v63, 4  ;;  %v1141_v20 = vrot.slane %v1139_v8, 4  ;;  %v265_v29 = vrot.slane %v263_v15, 5 }
  0x25   : > { %v536_v18 = vsel %vm2280_vm6, %v531_v5, %v535_v54  ;;  %v271_v30 = vrot.slane %v269_v16, 5  ;;  %v273_v32 = vshrl.u32 %v179_v51, 16  ;;  %v279_v34 = vshll.u32 %v217_v56, 16 }
  0x26   : > { %2006 = vmatpush.bf16.msrb.mxu3 %v2195_v0  ;;  %v1911_v0 = vrot.slane %v1080_v52, 9  ;;  %v660_v17 = vpack.c.b16 %v629_v2, %v628_v62  ;;  %v546_v22 = vsel %vm2280_vm6, %v541_v12, %v545_v59  ;;  %v652_v23 = vunpack.c.l.b16 %v536_v18  ;;  %v180_v59 = vld [vmem:[%s2239_s28 + $0x18] sm:$0xf] }
  0x27   : > { %v653_v26 = vunpack.c.l.b16 %v546_v22  ;;  %v1143_v28 = vsel %vm2254_vm5, %v1141_v20, %v1142_v11  ;;  %v548_v35 = vshrl.u32 %v202_v21, 16  ;;  %v551_v39 = vshll.u32 %v202_v21, 16  ;;  %v204_v21 = vld [vmem:[%s2239_s28 + $0xa8] sm:$0xf]  ;;  %v2340_v22 = vld [vmem:[%s2239_s28 + $0xac] sm:$0xf] }
  0x28   : > { %v1140_v19 = vsel %vm2254_vm5, %v1911_v0, %v1139_v8  ;;  %1798 = vmatmul.msk.bf16.vlgmr.msra.gmra.mxu0 %vm700_vm2, %v660_v17  ;;  %v1254_v31 = vunpack.c.l.b16 %v1143_v28  ;;  %v557_v40 = vshll.u32 %v2307_v25, 16  ;;  %v275_v42 = vrot.slane %v273_v32, 4  ;;  %v2347_v32 = vld [vmem:[%s2239_s28 + $0xb0] sm:$0x1] }
  0x29   : > { %v1253_v24 = vunpack.c.l.b16 %v1140_v19  ;;  %v672_v36 = vpack.c.b16 %v653_v26, %v652_v23  ;;  %v550_v44 = vrot.slane %v548_v35, 4  ;;  %v553_v46 = vrot.slane %v551_v39, 5 }
  0x2a   : > { %2007 = vmatpush.bf16.msrb.mxu3 %v2211_v3  ;;  %v262_v3 = vrot.slane %v260_v13, 4  ;;  %v559_v47 = vrot.slane %v557_v40, 5  ;;  %v561_v48 = vshrl.u32 %v2307_v25, 16  ;;  %v276_v51 = vor.u32 %v275_v42, %v271_v30 }
  0x2b   : > { %1810 = vmatmul.msk.bf16.vlgmr.msra.gmra.mxu3 %vm700_vm2, %v672_v36  ;;  %v281_v52 = vrot.slane %v279_v34, 5  ;;  %v567_v53 = vshll.u32 %v2314_v38, 16  ;;  %v1146_v54 = vrot.slane %v181_v41, 5  ;;  %v1284_v55 = vpack.c.b16 %v1254_v31, %v1253_v24 }
  0x2c   : > { %v266_v37 = vor.u32 %v265_v29, %v262_v3  ;;  %v554_v57 = vor.u32 %v553_v46, %v550_v44  ;;  %v563_v58 = vrot.slane %v561_v48, 4  ;;  %v277_v60 = vrot.slane %v276_v51, 4  ;;  %v182_v46 = vld [vmem:[%s2239_s28 + $0x24] sm:$0xf] }
  0x2d   : > { %v1912_v62 = vrot.slane %v1081_v49, 9  ;;  %v1149_v63 = vrot.slane %v218_v45, 5  ;;  %v569_v5 = vrot.slane %v567_v53, 5  ;;  %v1148_v8 = vrot.slane %v1146_v54, 4 }
  0x2e   : > { %2008 = vmatpush.bf16.msrb.mxu3 %v2226_v6  ;;  %v267_v6 = vrot.slane %v266_v37, 4  ;;  %v555_v0 = vrot.slane %v554_v57, 4  ;;  %v564_v2 = vor.u32 %v563_v58, %v559_v47  ;;  %v284_v11 = vshrl.u32 %v180_v59, 16 }
  0x2f   : > { %v287_v12 = vshll.u32 %v180_v59, 16  ;;  %v293_v13 = vshll.u32 %v181_v41, 16  ;;  %v1147_v18 = vsel %vm2254_vm5, %v1912_v62, %v1146_v54  ;;  %v297_v26 = vshrl.u32 %v181_v41, 16  ;;  %v183_v54 = vld [vmem:[%s2239_s28 + $0x28] sm:$0xf]  ;;  %v1974_v59 = vld [vmem:[%s2239_s28 + $0x18] sm:$0xff] }
  0x30   : > { %v272_v56 = vsel %vm2280_vm6, %v267_v6, %v271_v30  ;;  %v560_v15 = vsel %vm2280_vm6, %v555_v0, %v559_v47  ;;  %v565_v16 = vrot.slane %v564_v2, 4  ;;  %v286_v19 = vrot.slane %v284_v11, 4  ;;  %v206_v0 = vld [vmem:[%s2239_s28 + $0xb4] sm:$0xf] }
  0x31   : > { %v630_v61 = vunpack.c.l.b16 %v272_v56  ;;  %v654_v17 = vunpack.c.l.b16 %v560_v15  ;;  %v289_v20 = vrot.slane %v287_v12, 5  ;;  %v295_v3 = vrot.slane %v293_v13, 5  ;;  %v2369_v13 = vld [vmem:[%s2239_s28 + $0xb8] sm:$0xf] }
  0x32   : > { %2009 = vmatpush.bf16.msrb.mxu3 %v2244_v9  ;;  %v282_v9 = vsel %vm2280_vm6, %v277_v60, %v281_v52  ;;  %v570_v24 = vsel %vm2280_vm6, %v565_v16, %v569_v5  ;;  %v303_v30 = vshll.u32 %v218_v45, 16  ;;  %v299_v31 = vrot.slane %v297_v26, 4  ;;  %v1082_v5 = vld [vmem:[%s2239_s28 + $0x24] sm:$0xe] }
  0x33   : > { %1895 = vmatmul.msk.bf16.gmra.mxu1 %vm700_vm2, %v1973_v50  ;;  %v655_v28 = vunpack.c.l.b16 %v570_v24  ;;  %v290_v29 = vor.u32 %v289_v20, %v286_v19  ;;  %v572_v34 = vshrl.u32 %v204_v21, 16  ;;  %v575_v35 = vshll.u32 %v204_v21, 16 }
  0x34   : > { %1951 = vmatmul.msk.bf16.gmra.mxu2 %vm700_vm2, %v1284_v55  ;;  %v581_v36 = vshll.u32 %v2340_v22, 16  ;;  %v305_v40 = vrot.slane %v303_v30, 5  ;;  %v585_v41 = vshrl.u32 %v2340_v22, 16  ;;  %v300_v42 = vor.u32 %v299_v31, %v295_v3 }
  0x35   : > { %v673_v37 = vpack.c.b16 %v655_v28, %v654_v17  ;;  %v291_v39 = vrot.slane %v290_v29, 4  ;;  %v574_v44 = vrot.slane %v572_v34, 4  ;;  %v577_v45 = vrot.slane %v575_v35, 5 }
  0x36   : > { %2010 = vmatpush.bf16.msra.mxu3 %v2200_v1  ;;  %v631_v1 = vunpack.c.l.b16 %v282_v9  ;;  %v583_v6 = vrot.slane %v581_v36, 5  ;;  %v1255_v47 = vunpack.c.l.b16 %v1147_v18  ;;  %v587_v49 = vrot.slane %v585_v41, 4 }
  0x37   : > { %v591_v50 = vshll.u32 %v2347_v32, 16  ;;  %v301_v51 = vrot.slane %v300_v42, 4  ;;  %v578_v52 = vor.u32 %v577_v45, %v574_v44  ;;  %v308_v55 = vshrl.u32 %v182_v46, 16 }
  0x38   : > { %v661_v23 = vpack.c.b16 %v631_v1, %v630_v61  ;;  %v588_v53 = vor.u32 %v587_v49, %v583_v6  ;;  %v317_v9 = vshll.u32 %v183_v54, 16  ;;  %v321_v17 = vshrl.u32 %v183_v54, 16 }
  0x39   : > { %v306_v56 = vsel %vm2280_vm6, %v301_v51, %v305_v40  ;;  %v579_v57 = vrot.slane %v578_v52, 4  ;;  %v593_v58 = vrot.slane %v591_v50, 5  ;;  %v310_v12 = vrot.slane %v308_v55, 4  ;;  %v184_v50 = vld [vmem:[%s2239_s28 + $0x30] sm:$0xf] }
  0x3a   : > { %2011 = vmatpush.bf16.msra.mxu3 %v2216_v4  ;;  %v1150_v4 = vsel %vm2254_vm5, %v1148_v8, %v1149_v63  ;;  %1799 = vmatmul.msk.bf16.gmra.mxu0 %vm700_vm2, %v661_v23  ;;  %v589_v62 = vrot.slane %v588_v53, 4  ;;  %v219_v63 = vld [vmem:[%s2239_s28 + $0x2c] sm:$0x1]  ;;  %v633_v2 = vunpack.c.l.b16 %v306_v56  ;;  %v311_v8 = vshll.u32 %v182_v46, 16  ;;  %v185_v52 = vld [vmem:[%s2239_s28 + $0x34] sm:$0xf] }
  0x3b   : > { %v1256_v48 = vunpack.c.l.b16 %v1150_v4  ;;  %1811 = vmatmul.msk.bf16.gmra.mxu3 %vm700_vm2, %v673_v37  ;;  %v584_v11 = vsel %vm2280_vm6, %v579_v57, %v583_v6  ;;  %v319_v16 = vrot.slane %v317_v9, 5  ;;  %v1913_v18 = vrot.slane %v1082_v5, 9  ;;  %v2378_v37 = vld [vmem:[%s2239_s28 + $0xbc] sm:$0x1]  ;;  %v1083_v9 = vld [vmem:[%s2239_s28 + $0x30] sm:$0xe] }
  0x3c   : > { %v594_v1 = vsel %vm2280_vm6, %v589_v62, %v593_v58  ;;  %v313_v15 = vrot.slane %v311_v8, 5  ;;  %v1156_v19 = vrot.slane %v219_v63, 5  ;;  %v596_v20 = vshrl.u32 %v206_v0, 16  ;;  %v1975_v58 = vld [vmem:[%s2239_s28 + $0x24] sm:$0xff]  ;;  %v220_v8 = vld [vmem:[%s2239_s28 + $0x38] sm:$0x1] }
  0x3d   : > { %v1285_v60 = vpack.c.b16 %v1256_v48, %v1255_v47  ;;  %v599_v21 = vshll.u32 %v206_v0, 16  ;;  %v605_v26 = vshll.u32 %v2369_v13, 16  ;;  %v656_v28 = vunpack.c.l.b16 %v584_v11 }
  0x3e   : > { %2012 = vmatpush.bf16.msra.mxu3 %v2231_v7  ;;  %v296_v7 = vsel %vm2280_vm6, %v291_v39, %v295_v3  ;;  %v323_v3 = vrot.slane %v321_v17, 4  ;;  %v657_v4 = vunpack.c.l.b16 %v594_v1  ;;  %v314_v29 = vor.u32 %v313_v15, %v310_v12 }
  0x3f   : > { %v632_v61 = vunpack.c.l.b16 %v296_v7  ;;  %v609_v30 = vshrl.u32 %v2369_v13, 16  ;;  %v327_v34 = vshll.u32 %v219_v63, 16  ;;  %v598_v35 = vrot.slane %v596_v20, 4 }
  0x40   : > { %v324_v31 = vor.u32 %v323_v3, %v319_v16  ;;  %v601_v36 = vrot.slane %v599_v21, 5  ;;  %v607_v39 = vrot.slane %v605_v26, 5  ;;  %v674_v41 = vpack.c.b16 %v657_v4, %v656_v28 }
  0x41   : > { %v662_v23 = vpack.c.b16 %v633_v2, %v632_v61  ;;  %v611_v40 = vrot.slane %v609_v30, 4  ;;  %v315_v45 = vrot.slane %v314_v29, 4  ;;  %v329_v46 = vrot.slane %v327_v34, 5 }
  0x42   : > { %2013 = vmatpush.bf16.msra.mxu3 %v2249_v10  ;;  %v1153_v10 = vrot.slane %v183_v54, 5  ;;  %v325_v6 = vrot.slane %v324_v31, 4  ;;  %v602_v47 = vor.u32 %v601_v36, %v598_v35  ;;  %v615_v48 = vshll.u32 %v2378_v37, 16  ;;  %v186_v35 = vld [vmem:[%s2239_s28 + $0x3c] sm:$0xf] }
  0x43   : > { %1896 = vmatmul.msk.bf16.gmra.mxu1 %vm700_vm2, %v1974_v59  ;;  %v612_v49 = vor.u32 %v611_v40, %v607_v39  ;;  %v320_v53 = vsel %vm2280_vm6, %v315_v45, %v319_v16  ;;  %v332_v57 = vshrl.u32 %v184_v50, 16  ;;  %v341_v61 = vshll.u32 %v185_v52, 16  ;;  %v187_v40 = vld [vmem:[%s2239_s28 + $0x40] sm:$0xf] }
  0x44   : > { %1952 = vmatmul.msk.bf16.gmra.mxu2 %vm700_vm2, %v1285_v60  ;;  %v1155_v24 = vrot.slane %v1153_v10, 4  ;;  %v1154_v42 = vsel %vm2254_vm5, %v1913_v18, %v1153_v10  ;;  %v330_v54 = vsel %vm2280_vm6, %v325_v6, %v329_v46  ;;  %v603_v55 = vrot.slane %v602_v47, 4 }
  0x45   : > { %v1257_v7 = vunpack.c.l.b16 %v1154_v42  ;;  %v617_v56 = vrot.slane %v615_v48, 5  ;;  %v613_v59 = vrot.slane %v612_v49, 4  ;;  %v335_v60 = vshll.u32 %v184_v50, 16 }
  0x46   : > { %v1157_v44 = vsel %vm2254_vm5, %v1155_v24, %v1156_v19  ;;  %v345_v62 = vshrl.u32 %v185_v52, 16  ;;  %v1160_v0 = vrot.slane %v185_v52, 5  ;;  %v634_v2 = vunpack.c.l.b16 %v320_v53  ;;  %v1084_v52 = vld [vmem:[%s2239_s28 + $0x3c] sm:$0xe] }
  0x47   : > { %v1258_v51 = vunpack.c.l.b16 %v1157_v44  ;;  %v635_v5 = vunpack.c.l.b16 %v330_v54  ;;  %v608_v10 = vsel %vm2280_vm6, %v603_v55, %v607_v39  ;;  %v334_v11 = vrot.slane %v332_v57, 4  ;;  %v1976_v44 = vld [vmem:[%s2239_s28 + $0x30] sm:$0xff] }
  0x48   : > { %v618_v12 = vsel %vm2280_vm6, %v613_v59, %v617_v56  ;;  %v337_v1 = vrot.slane %v335_v60, 5  ;;  %v343_v15 = vrot.slane %v341_v61, 5  ;;  %v347_v16 = vrot.slane %v345_v62, 4 }
  0x49   : > { %v1286_v63 = vpack.c.b16 %v1258_v51, %v1257_v7  ;;  %v1914_v17 = vrot.slane %v1083_v9, 9  ;;  %v1162_v18 = vrot.slane %v1160_v0, 4  ;;  %v1163_v19 = vrot.slane %v220_v8, 5  ;;  %v221_v51 = vld [vmem:[%s2239_s28 + $0x44] sm:$0x1] }
  0x4a   : > { %1800 = vmatmul.msk.bf16.gmra.mxu0 %vm700_vm2, %v662_v23  ;;  %v663_v20 = vpack.c.b16 %v635_v5, %v634_v2  ;;  %v658_v21 = vunpack.c.l.b16 %v608_v10  ;;  %v659_v23 = vunpack.c.l.b16 %v618_v12  ;;  %v338_v24 = vor.u32 %v337_v1, %v334_v11  ;;  %v1984_v5 = vld [vmem:[%s2239_s28 + $0x90] sm:$0xff]  ;;  %v189_v10 = vld [vmem:[%s2239_s28 + $0x4c] sm:$0xf] }
  0x4b   : > { %1812 = vmatmul.msk.bf16.gmra.mxu3 %vm700_vm2, %v674_v41  ;;  %v348_v3 = vor.u32 %v347_v16, %v343_v15  ;;  %v351_v26 = vshll.u32 %v220_v8, 16  ;;  %v1161_v28 = vsel %vm2254_vm5, %v1914_v17, %v1160_v0  ;;  %v1164_v4 = vsel %vm2254_vm5, %v1162_v18, %v1163_v19  ;;  %v188_v8 = vld [vmem:[%s2239_s28 + $0x48] sm:$0xf] }
  0x4c   : > { %v675_v29 = vpack.c.b16 %v659_v23, %v658_v21  ;;  %v339_v30 = vrot.slane %v338_v24, 4  ;;  %v1259_v36 = vunpack.c.l.b16 %v1161_v28  ;;  %v1260_v39 = vunpack.c.l.b16 %v1164_v4 }
  0x4d   : > { %v349_v31 = vrot.slane %v348_v3, 4  ;;  %v353_v34 = vrot.slane %v351_v26, 5  ;;  %v356_v41 = vshrl.u32 %v186_v35, 16  ;;  %v359_v42 = vshll.u32 %v186_v35, 16  ;;  %v1085_v26 = vld [vmem:[%s2239_s28 + $0x48] sm:$0xe] }
  0x4e   : > { %v344_v45 = vsel %vm2280_vm6, %v339_v30, %v343_v15  ;;  %v365_v46 = vshll.u32 %v187_v40, 16  ;;  %v369_v47 = vshrl.u32 %v187_v40, 16  ;;  %v1287_v48 = vpack.c.b16 %v1260_v39, %v1259_v36  ;;  %v222_v35 = vld [vmem:[%s2239_s28 + $0x50] sm:$0x1] }
  0x4f   : > { %v354_v6 = vsel %vm2280_vm6, %v349_v31, %v353_v34  ;;  %v1167_v49 = vrot.slane %v187_v40, 5  ;;  %v636_v50 = vunpack.c.l.b16 %v344_v45  ;;  %v358_v53 = vrot.slane %v356_v41, 4 }
  0x50   : > { %v637_v7 = vunpack.c.l.b16 %v354_v6  ;;  %v361_v54 = vrot.slane %v359_v42, 5  ;;  %v367_v55 = vrot.slane %v365_v46, 5  ;;  %v371_v56 = vrot.slane %v369_v47, 4 }
  0x51   : > { %v1915_v57 = vrot.slane %v1084_v52, 9  ;;  %v1170_v59 = vrot.slane %v221_v51, 5  ;;  %v380_v16 = vshrl.u32 %v188_v8, 16  ;;  %v383_v17 = vshll.u32 %v188_v8, 16 }
  0x52   : > { %v664_v60 = vpack.c.b16 %v637_v7, %v636_v50  ;;  %v362_v61 = vor.u32 %v361_v54, %v358_v53  ;;  %v372_v62 = vor.u32 %v371_v56, %v367_v55  ;;  %v389_v18 = vshll.u32 %v189_v10, 16  ;;  %v1985_v50 = vld [vmem:[%s2239_s28 + $0x9c] sm:$0xff]  ;;  %v191_v7 = vld [vmem:[%s2239_s28 + $0x58] sm:$0xf] }
  0x53   : > { %1897 = vmatmul.msk.bf16.gmra.mxu1 %vm700_vm2, %v1975_v58  ;;  %v1169_v58 = vrot.slane %v1167_v49, 4  ;;  %v1168_v0 = vsel %vm2254_vm5, %v1915_v57, %v1167_v49  ;;  %v393_v19 = vshrl.u32 %v189_v10, 16  ;;  %v1174_v3 = vrot.slane %v189_v10, 5  ;;  %v223_v10 = vld [vmem:[%s2239_s28 + $0x5c] sm:$0x1] }
  0x54   : > { %1953 = vmatmul.msk.bf16.gmra.mxu2 %vm700_vm2, %v1286_v63  ;;  %v375_v63 = vshll.u32 %v221_v51, 16  ;;  %v363_v9 = vrot.slane %v362_v61, 4  ;;  %v373_v11 = vrot.slane %v372_v62, 4  ;;  %v1261_v1 = vunpack.c.l.b16 %v1168_v0  ;;  %v190_v51 = vld [vmem:[%s2239_s28 + $0x54] sm:$0xf] }
  0x55   : > { %v1171_v2 = vsel %vm2254_vm5, %v1169_v58, %v1170_v59  ;;  %v382_v28 = vrot.slane %v380_v16, 4  ;;  %v385_v4 = vrot.slane %v383_v17, 5  ;;  %v395_v30 = vrot.slane %v393_v19, 4 }
  0x56   : > { %v377_v12 = vrot.slane %v375_v63, 5  ;;  %v1262_v15 = vunpack.c.l.b16 %v1171_v2  ;;  %v368_v21 = vsel %vm2280_vm6, %v363_v9, %v367_v55  ;;  %v1916_v36 = vrot.slane %v1085_v26, 9  ;;  %v1086_v2 = vld [vmem:[%s2239_s28 + $0x54] sm:$0xe] }
  0x57   : > { %v638_v31 = vunpack.c.l.b16 %v368_v21  ;;  %v1176_v39 = vrot.slane %v1174_v3, 4  ;;  %v1177_v40 = vrot.slane %v222_v35, 5  ;;  %v386_v41 = vor.u32 %v385_v4, %v382_v28 }
  0x58   : > { %v378_v23 = vsel %vm2280_vm6, %v373_v11, %v377_v12  ;;  %v1288_v24 = vpack.c.b16 %v1262_v15, %v1261_v1  ;;  %v1175_v6 = vsel %vm2254_vm5, %v1916_v36, %v1174_v3  ;;  %v404_v56 = vshrl.u32 %v190_v51, 16 }
  0x59   : > { %v639_v34 = vunpack.c.l.b16 %v378_v23  ;;  %v1178_v46 = vsel %vm2254_vm5, %v1176_v39, %v1177_v40  ;;  %v387_v47 = vrot.slane %v386_v41, 4  ;;  %v1263_v52 = vunpack.c.l.b16 %v1175_v6  ;;  %v1091_v23 = vld [vmem:[%s2239_s28 + $0x90] sm:$0xe]  ;;  %v193_v40 = vld [vmem:[%s2239_s28 + $0x64] sm:$0xf]  ;;  %v1979_v6 = vld [vmem:[%s2239_s28 + $0x54] sm:$0xff] }
  0x5a   : > { %1801 = vmatmul.msk.bf16.gmra.mxu0 %vm700_vm2, %v663_v20  ;;  %v1977_v20 = vld [vmem:[%s2239_s28 + $0x3c] sm:$0xff]  ;;  %v1264_v53 = vunpack.c.l.b16 %v1178_v46  ;;  %v407_v57 = vshll.u32 %v190_v51, 16  ;;  %v413_v58 = vshll.u32 %v191_v7, 16  ;;  %v417_v59 = vshrl.u32 %v191_v7, 16 }
  0x5b   : > { %1813 = vmatmul.msk.bf16.gmra.mxu3 %vm700_vm2, %v675_v29  ;;  %v391_v29 = vrot.slane %v389_v18, 5  ;;  %v665_v45 = vpack.c.b16 %v639_v34, %v638_v31  ;;  %v1216_v61 = vrot.slane %v2266_v27, 5  ;;  %v406_v8 = vrot.slane %v404_v56, 4  ;;  %v192_v41 = vld [vmem:[%s2239_s28 + $0x60] sm:$0xf] }
  0x5c   : > { %v1289_v62 = vpack.c.b16 %v1264_v53, %v1263_v52  ;;  %v409_v9 = vrot.slane %v407_v57, 5  ;;  %v415_v11 = vrot.slane %v413_v58, 5  ;;  %v419_v12 = vrot.slane %v417_v59, 4  ;;  %v224_v53 = vld [vmem:[%s2239_s28 + $0x68] sm:$0x1] }
  0x5d   : > { %v396_v42 = vor.u32 %v395_v30, %v391_v29  ;;  %v392_v54 = vsel %vm2280_vm6, %v387_v47, %v391_v29  ;;  %v1218_v1 = vrot.slane %v1216_v61, 4  ;;  %v1917_v15 = vrot.slane %v1086_v2, 9  ;;  %v1986_v29 = vld [vmem:[%s2239_s28 + $0xa8] sm:$0xff] }
  0x5e   : > { %v640_v63 = vunpack.c.l.b16 %v392_v54  ;;  %v1219_v27 = vrot.slane %v2271_v33, 5  ;;  %v1184_v17 = vrot.slane %v223_v10, 5  ;;  %v423_v18 = vshll.u32 %v223_v10, 16  ;;  %v1087_v54 = vld [vmem:[%s2239_s28 + $0x60] sm:$0xe] }
  0x5f   : > { %v420_v21 = vor.u32 %v419_v12, %v415_v11  ;;  %v428_v46 = vshrl.u32 %v192_v41, 16  ;;  %v431_v47 = vshll.u32 %v192_v41, 16  ;;  %v1918_v59 = vrot.slane %v1087_v54, 9  ;;  %v1092_v54 = vld [vmem:[%s2239_s28 + $0x9c] sm:$0xe] }
  0x60   : > { %v425_v28 = vrot.slane %v423_v18, 5  ;;  %v1220_v4 = vsel %vm2254_vm5, %v1218_v1, %v1219_v27  ;;  %v447_v2 = vshll.u32 %v224_v53, 16 }
  0x61   : > { %v421_v31 = vrot.slane %v420_v21, 4  ;;  %v433_v56 = vrot.slane %v431_v47, 5  ;;  %v1980_v21 = vld [vmem:[%s2239_s28 + $0x60] sm:$0xff] }
  0x62   : > { %v449_v1 = vrot.slane %v447_v2, 5  ;;  %v197_v2 = vld [vmem:[%s2239_s28 + $0x7c] sm:$0xf] }
  0x63   : > { %1898 = vmatmul.msk.bf16.gmra.mxu1 %vm700_vm2, %v1976_v44  ;;  %v399_v44 = vshll.u32 %v222_v35, 16  ;;  %v1276_v35 = vunpack.c.l.b16 %v1220_v4  ;;  %v225_v4 = vld [vmem:[%s2239_s28 + $0x74] sm:$0x1] }
  0x64   : > { %1954 = vmatmul.msk.bf16.gmra.mxu2 %vm700_vm2, %v1287_v48  ;;  %v397_v48 = vrot.slane %v396_v42, 4  ;;  %v1198_v41 = vrot.slane %v225_v4, 5 }
  0x65   : > { %v401_v49 = vrot.slane %v399_v44, 5 }
  0x67   : > { %v402_v55 = vsel %vm2280_vm6, %v397_v48, %v401_v49  ;;  %v437_v48 = vshll.u32 %v193_v40, 16  ;;  %v441_v49 = vshrl.u32 %v193_v40, 16 }
  0x68   : > { %v641_v0 = vunpack.c.l.b16 %v402_v55  ;;  %v430_v55 = vrot.slane %v428_v46, 4  ;;  %v471_v46 = vshll.u32 %v225_v4, 16 }
  0x69   : > { %v439_v57 = vrot.slane %v437_v48, 5  ;;  %v443_v58 = vrot.slane %v441_v49, 4 }
  0x6a   : > { %1802 = vmatmul.msk.bf16.gmra.mxu0 %vm700_vm2, %v664_v60  ;;  %v1978_v60 = vld [vmem:[%s2239_s28 + $0x48] sm:$0xff]  ;;  %v666_v19 = vpack.c.b16 %v641_v0, %v640_v63  ;;  %v434_v63 = vor.u32 %v433_v56, %v430_v55 }
  0x6b   : > { %1906 = vmatmul.msk.bf16.vlgmr.msrb.gmra.mxu3 %vm700_vm2, %v1984_v5  ;;  %v1181_v5 = vrot.slane %v191_v7, 5  ;;  %v1188_v7 = vrot.slane %v193_v40, 5  ;;  %v444_v0 = vor.u32 %v443_v58, %v439_v57 }
  0x6d   : > { %v1183_v16 = vrot.slane %v1181_v5, 4  ;;  %v1182_v3 = vsel %vm2254_vm5, %v1917_v15, %v1181_v5  ;;  %v1189_v5 = vsel %vm2254_vm5, %v1918_v59, %v1188_v7  ;;  %v445_v12 = vrot.slane %v444_v0, 4  ;;  %v195_v15 = vld [vmem:[%s2239_s28 + $0x70] sm:$0xf] }
  0x6e   : > { %v1265_v36 = vunpack.c.l.b16 %v1182_v3  ;;  %v1267_v27 = vunpack.c.l.b16 %v1189_v5  ;;  %v473_v59 = vrot.slane %v471_v46, 5  ;;  %v1226_v0 = vrot.slane %v2314_v38, 5 }
  0x6f   : > { %v1185_v26 = vsel %vm2254_vm5, %v1183_v16, %v1184_v17  ;;  %v485_v38 = vshll.u32 %v197_v2, 16 }
  0x70   : > { %v1266_v39 = vunpack.c.l.b16 %v1185_v26 }
  0x73   : > { %1899 = vmatmul.msk.bf16.gmra.mxu1 %vm700_vm2, %v1977_v20  ;;  %v410_v20 = vor.u32 %v409_v9, %v406_v8  ;;  %v1987_v8 = vld [vmem:[%s2239_s28 + $0xb4] sm:$0xff]  ;;  %v194_v9 = vld [vmem:[%s2239_s28 + $0x6c] sm:$0xf] }
  0x74   : > { %1955 = vmatmul.msk.bf16.gmra.mxu2 %vm700_vm2, %v1288_v24  ;;  %v1922_v24 = vrot.slane %v1091_v23, 9  ;;  %v452_v17 = vshrl.u32 %v194_v9, 16  ;;  %v455_v18 = vshll.u32 %v194_v9, 16 }
  0x75   : > { %v411_v30 = vrot.slane %v410_v20, 4  ;;  %v465_v20 = vshrl.u32 %v195_v15, 16 }
  0x76   : > { %v1217_v33 = vsel %vm2254_vm5, %v1922_v24, %v1216_v61  ;;  %v1191_v61 = vrot.slane %v224_v53, 5  ;;  %v450_v24 = vsel %vm2280_vm6, %v445_v12, %v449_v1  ;;  %v489_v1 = vshrl.u32 %v197_v2, 16 }
  0x77   : > { %v1275_v34 = vunpack.c.l.b16 %v1217_v33  ;;  %v416_v44 = vsel %vm2280_vm6, %v411_v30, %v415_v11  ;;  %v435_v11 = vrot.slane %v434_v63, 4  ;;  %v1195_v33 = vrot.slane %v195_v15, 5 }
  0x78   : > { %v642_v51 = vunpack.c.l.b16 %v416_v44  ;;  %v457_v30 = vrot.slane %v455_v18, 5 }
  0x79   : > { %v2470_v42 = vpack.c.b16 %v1276_v35, %v1275_v34  ;;  %v440_v23 = vsel %vm2280_vm6, %v435_v11, %v439_v57  ;;  %v645_v34 = vunpack.c.l.b16 %v450_v24  ;;  %v1197_v40 = vrot.slane %v1195_v33, 4 }
  0x7a   : > { %1803 = vmatmul.msk.bf16.gmra.mxu0 %vm700_vm2, %v665_v45  ;;  %v426_v45 = vsel %vm2280_vm6, %v421_v31, %v425_v28  ;;  %v1088_v28 = vld [vmem:[%s2239_s28 + $0x6c] sm:$0xe]  ;;  %v644_v31 = vunpack.c.l.b16 %v440_v23 }
  0x7b   : > { %1907 = vmatmul.msk.bf16.gmra.mxu3 %vm700_vm2, %v1985_v50  ;;  %v1290_v50 = vpack.c.b16 %v1266_v39, %v1265_v36  ;;  %v643_v52 = vunpack.c.l.b16 %v426_v45  ;;  %v467_v36 = vrot.slane %v465_v20, 4  ;;  %v1919_v39 = vrot.slane %v1088_v28, 9 }
  0x7c   : > { %v668_v45 = vpack.c.b16 %v645_v34, %v644_v31  ;;  %v1199_v53 = vsel %vm2254_vm5, %v1197_v40, %v1198_v41  ;;  %v1089_v31 = vld [vmem:[%s2239_s28 + $0x78] sm:$0xe]  ;;  %v2542_v34 = vrot.slane %v485_v38, 5 }
  0x7d   : > { %v1196_v49 = vsel %vm2254_vm5, %v1919_v39, %v1195_v33  ;;  %v1920_v41 = vrot.slane %v1089_v31, 9 }
  0x7e   : > { %v1269_v57 = vunpack.c.l.b16 %v1196_v49 }
  0x83   : > { %1900 = vmatmul.msk.bf16.gmra.mxu1 %vm700_vm2, %v1978_v60  ;;  %v1190_v60 = vrot.slane %v1188_v7, 4 }
  0x84   : > { %1956 = vmatmul.msk.bf16.gmra.mxu2 %vm700_vm2, %v1289_v62  ;;  %v667_v62 = vpack.c.b16 %v643_v52, %v642_v51  ;;  %v2506_v51 = vld [vmem:[%s2805_s2] ss:$0 sm:$0xff] }
  0x85   : > { %v1192_v10 = vsel %vm2254_vm5, %v1190_v60, %v1191_v61  ;;  %v196_v60 = vld [vmem:[%s2239_s28 + $0x78] sm:$0xf]  ;;  %v1270_v61 = vunpack.c.l.b16 %v1199_v53 }
  0x86   : > { %v1268_v16 = vunpack.c.l.b16 %v1192_v10  ;;  %v479_v9 = vshll.u32 %v196_v60, 16 }
  0x88   : > { %v1291_v26 = vpack.c.b16 %v1268_v16, %v1267_v27  ;;  %v1981_v16 = vld [vmem:[%s2239_s28 + $0x6c] sm:$0xff]  ;;  %v481_v33 = vrot.slane %v479_v9, 5  ;;  %v199_v9 = vld [vmem:[%s2239_s28 + $0x88] sm:$0xf] }
  0x8a   : > { %1804 = vmatmul.msk.bf16.gmra.mxu0 %vm700_vm2, %v666_v19  ;;  %v461_v19 = vshll.u32 %v195_v15, 16 }
  0x8b   : > { %1908 = vmatmul.msk.bf16.gmra.mxu3 %vm700_vm2, %v1986_v29  ;;  %v454_v29 = vrot.slane %v452_v17, 4  ;;  %v1292_v17 = vpack.c.b16 %v1270_v61, %v1269_v57 }
  0x8c   : > { %v463_v35 = vrot.slane %v461_v19, 5 }
  0x8d   : > { %v458_v44 = vor.u32 %v457_v30, %v454_v29  ;;  %v226_v30 = vld [vmem:[%s2239_s28 + $0x80] sm:$0x1] }
  0x8f   : > { %v459_v55 = vrot.slane %v458_v44, 4 }
  0x91   : > { %v464_v10 = vsel %vm2280_vm6, %v459_v55, %v463_v35 }
  0x92   : > { %v646_v23 = vunpack.c.l.b16 %v464_v10 }
  0x93   : > { %1901 = vmatmul.msk.bf16.gmra.mxu1 %vm700_vm2, %v1979_v6  ;;  %v468_v6 = vor.u32 %v467_v36, %v463_v35  ;;  %v491_v35 = vrot.slane %v489_v1, 4 }
  0x94   : > { %1957 = vmatmul.msk.bf16.gmra.mxu2 %vm700_vm2, %v1290_v50  ;;  %v1223_v50 = vrot.slane %v2307_v25, 5  ;;  %v2515_v25 = vld [vmem:[%s2805_s2 + $0x1] ss:$0 sm:$0xff] }
  0x95   : > { %v469_v58 = vrot.slane %v468_v6, 4  ;;  %v495_v6 = vshll.u32 %v226_v30, 16  ;;  %v492_v49 = vor.u32 %v491_v35, %v2542_v34 }
  0x96   : > { %v1225_v63 = vrot.slane %v1223_v50, 4 }
  0x97   : > { %v474_v12 = vsel %vm2280_vm6, %v469_v58, %v473_v59  ;;  %v497_v59 = vrot.slane %v495_v6, 5 }
  0x98   : > { %v1227_v19 = vsel %vm2254_vm5, %v1225_v63, %v1226_v0  ;;  %v493_v0 = vrot.slane %v492_v49, 4 }
  0x99   : > { %v1278_v40 = vunpack.c.l.b16 %v1227_v19 }
  0x9a   : > { %1805 = vmatmul.msk.bf16.gmra.mxu0 %vm700_vm2, %v667_v62  ;;  %v1923_v62 = vrot.slane %v1092_v54, 9 }
  0x9b   : > { %1909 = vmatmul.msk.bf16.gmra.mxu3 %vm700_vm2, %v1987_v8  ;;  %v476_v8 = vshrl.u32 %v196_v60, 16  ;;  %v1230_v60 = vrot.slane %v2340_v22, 5  ;;  %v1233_v22 = vrot.slane %v2347_v32, 5  ;;  %v513_v32 = vshrl.u32 %v199_v9, 16 }
  0x9c   : > { %v1224_v18 = vsel %vm2254_vm5, %v1923_v62, %v1223_v50 }
  0x9d   : > { %v478_v28 = vrot.slane %v476_v8, 4  ;;  %v1277_v39 = vunpack.c.l.b16 %v1224_v18  ;;  %v1232_v38 = vrot.slane %v1230_v60, 4  ;;  %v1982_v18 = vld [vmem:[%s2239_s28 + $0x78] sm:$0xff] }
  0x9f   : > { %v1296_v54 = vpack.c.b16 %v1278_v40, %v1277_v39  ;;  %v1090_v39 = vld [vmem:[%s2239_s28 + $0x84] sm:$0xe] }
  0xa0   : > { %v999_v3 = vpop.f32.mrf.mxu1 }
  0xa3   : > { %1902 = vmatmul.msk.bf16.gmra.mxu1 %vm700_vm2, %v1980_v21 }
  0xa4   : > { %1958 = vmatmul.msk.bf16.gmra.mxu2 %vm700_vm2, %v1291_v26  ;;  %v1202_v26 = vrot.slane %v197_v2, 5  ;;  %v1093_v2 = vld [vmem:[%s2239_s28 + $0xa8] sm:$0xe] }
  0xa5   : > { %v758_v47 = vpop.f32.mrf.mxu0 }
  0xa6   : > { %v1000_v7 = vadd.f32 %v999_v3, %v758_v47  ;;  %v647_v3 = vunpack.c.l.b16 %v474_v12  ;;  %v1204_v44 = vrot.slane %v1202_v26, 4  ;;  %v1203_v57 = vsel %vm2254_vm5, %v1920_v41, %v1202_v26 }
  0xa7   : > { %v1380_v48 = vpop.f32.mrf.mxu2  ;;  %v1271_v10 = vunpack.c.l.b16 %v1203_v57  ;;  %v1924_v12 = vrot.slane %v1093_v2, 9 }
  0xa8   : > { %v1001_v52 = vpop.f32.mrf.mxu1  ;;  %v1460_v56 = vadd.f32 %v1380_v48, %v1000_v7  ;;  %v669_v47 = vpack.c.b16 %v647_v3, %v646_v23  ;;  %v482_v48 = vor.u32 %v481_v33, %v478_v28 }
  0xa9   : > { %v1231_v33 = vsel %vm2254_vm5, %v1924_v12, %v1230_v60 }
  0xaa   : > { %1806 = vmatmul.msk.bf16.gmra.mxu0 %vm700_vm2, %v668_v45  ;;  %v1494_v5 = vmul.f32 %v2506_v51, %v1460_v56  ;;  %v1205_v45 = vrot.slane %v226_v30, 5  ;;  %v483_v63 = vrot.slane %v482_v48, 4 }
  0xab   : > { %1962 = vmatmul.msk.bf16.vlgmr.msra.gmra.mxu3 %vm700_vm2, %v2470_v42 }
  0xac   : > { %v1528_v11 = vadd.f32 %v2515_v25, %v1494_v5  ;;  %v1206_v58 = vsel %vm2254_vm5, %v1204_v44, %v1205_v45  ;;  %v515_v45 = vrot.slane %v513_v32, 4  ;;  %v1240_v32 = vrot.slane %v2378_v37, 5 }
  0xad   : > { %v760_v15 = vpop.f32.mrf.mxu0  ;;  %v1272_v8 = vunpack.c.l.b16 %v1206_v58 }
  0xae   : > { %vm1560_vm7 = vcmp.ge.f32.partialorder %v1528_v11, 0.0  ;;  %v1592_v42 = vmul.f32 0.2, %v1528_v11  ;;  %v1002_v20 = vadd.f32 %v1001_v52, %v760_v15  ;;  %v2538_v24 = vpop.f32.mrf.mxu3  ;;  %v488_v15 = vsel %vm2280_vm6, %v483_v63, %v2542_v34 }
  0xaf   : > { %v1382_v27 = vpop.f32.mrf.mxu2  ;;  %v1293_v26 = vpack.c.b16 %v1272_v8, %v1271_v10  ;;  %v648_v34 = vunpack.c.l.b16 %v488_v15  ;;  %v1237_v8 = vrot.slane %v2369_v13, 5 }
  0xb0   : > { %v1004_v21 = vpop.f32.mrf.mxu1  ;;  %v1624_v4 = vsel %vm1560_vm7, %v1528_v11, %v1592_v42  ;;  %v1461_v29 = vadd.f32 %v1382_v27, %v1002_v20  ;;  %v198_v11 = vld [vmem:[%s2239_s28 + $0x84] sm:$0xf]  ;;  %v498_v27 = vsel %vm2280_vm6, %v493_v0, %v497_v59  ;;  %v509_v20 = vshll.u32 %v199_v9, 16 }
  0xb1   : > { %1656 = vst.msk [vmem:[%s2545_s20] sm:$0xff] %vm700_vm2, %v1624_v4  ;;  %v500_v19 = vshrl.u32 %v198_v11, 16  ;;  %v503_v42 = vshll.u32 %v198_v11, 16  ;;  %v1234_v4 = vsel %vm2254_vm5, %v1232_v38, %v1233_v22  ;;  %v649_v35 = vunpack.c.l.b16 %v498_v27  ;;  %v1094_v38 = vld [vmem:[%s2239_s28 + $0xb4] sm:$0xe] }
  0xb2   : > { %v1495_v36 = vmul.f32 %v2506_v51, %v1461_v29  ;;  %v1209_v29 = vrot.slane %v199_v9, 5  ;;  %v511_v44 = vrot.slane %v509_v20, 5  ;;  %v1239_v20 = vrot.slane %v1237_v8, 4 }
  0xb3   : > { %1903 = vmatmul.msk.bf16.gmra.mxu1 %vm700_vm2, %v1981_v16  ;;  %v502_v40 = vrot.slane %v500_v19, 4  ;;  %v505_v41 = vrot.slane %v503_v42, 5  ;;  %v1983_v19 = vld [vmem:[%s2239_s28 + $0x84] sm:$0xff] }
  0xb4   : > { %1959 = vmatmul.msk.bf16.gmra.mxu2 %vm700_vm2, %v1292_v17  ;;  %v1529_v46 = vadd.f32 %v2515_v25, %v1495_v36  ;;  %v227_v36 = vld [vmem:[%s2239_s28 + $0x8c] sm:$0x1]  ;;  %v516_v57 = vor.u32 %v515_v45, %v511_v44  ;;  %v1241_v37 = vsel %vm2254_vm5, %v1239_v20, %v1240_v32  ;;  %s1704_s28 = sshll.u32 %s1701_s27, 4  ;;  %s1705_s28 = int_to_ptr.hbm [resolvable:$true] %s1704_s28 }
  0xb5   : > { %v1212_v48 = vrot.slane %v227_v36, 5  ;;  %v519_v58 = vshll.u32 %v227_v36, 16  ;;  %s2072_s30 = sshra.s32 %s1705_s28, 4  ;;  %s2073_s30 = int_to_ptr.hbm [resolvable:$true] %s2072_s30 }
  0xb6   : > { %vm1561_vm8 = vcmp.ge.f32.partialorder %v1529_v46, 0.0  ;;  %v1593_v52 = vmul.f32 0.2, %v1529_v46  ;;  %v2554_v56 = vpop.f32.mrf.mxu3  ;;  %v517_v11 = vrot.slane %v516_v57, 4  ;;  %s2074_s4 = scalar_lea.hbm %s2073_s30, 256  ;;  %p2079_p0 = scmp.lt.s32.totalorder %s2073_s30, %s2806_s3 }
  0xb7   : > { %v763_v50 = vpop.f32.mrf.mxu0  ;;  %v1385_v7 = vpop.f32.mrf.mxu2  ;;  %v521_v12 = vrot.slane %v519_v58, 5  ;;  %p2075_p11 = scmp.ne.s32.totalorder %s2073_s30, %s2074_s4  ;;  %p2080_p1 = scmp.lt.s32.totalorder %s2078_s7, %s2074_s4 }
  0xb8   : > { %v1005_v53 = vadd.f32 %v1004_v21, %v763_v50  ;;  %v1006_v55 = vpop.f32.mrf.mxu1  ;;  %v1625_v61 = vsel %vm1561_vm8, %v1529_v46, %v1593_v52  ;;  %v1921_v46 = vrot.slane %v1090_v39, 9  ;;  %v670_v50 = vpack.c.b16 %v649_v35, %v648_v34 }
  0xb9   : > { %1657 = vst.msk [vmem:[%s2545_s20 + $0x8] sm:$0xff] %vm700_vm2, %v1625_v61  ;;  %v1280_v52 = vunpack.c.l.b16 %v1234_v4  ;;  %v522_v42 = vsel %vm2280_vm6, %v517_v11, %v521_v12  ;;  %p2076_p12 = pnand %p2075_p11, %p2182_p5  ;;  %p2081_p2 = por %p2080_p1, %p2079_p0 }
  0xba   : > { %v1462_v62 = vadd.f32 %v1385_v7, %v1005_v53  ;;  %1807 = vmatmul.msk.bf16.gmra.mxu0 %vm700_vm2, %v669_v47  ;;  %v1211_v47 = vrot.slane %v1209_v29, 4  ;;  %v1279_v7 = vunpack.c.l.b16 %v1231_v33  ;;  %v1210_v63 = vsel %vm2254_vm5, %v1921_v46, %v1209_v29 }
  0xbb   : > { %1963 = vmatmul.msk.bf16.gmra.mxu3 %vm700_vm2, %v1296_v54  ;;  %p2077_p13 = pneg %p2076_p12 }
  0xbc   : > { %v1496_v5 = vmul.f32 %v2506_v51, %v1462_v62  ;;  %v1213_v0 = vsel %vm2254_vm5, %v1211_v47, %v1212_v48  ;;  %v1297_v10 = vpack.c.b16 %v1280_v52, %v1279_v7 }
  0xbd   : > { %v1274_v15 = vunpack.c.l.b16 %v1213_v0  ;;  %p2082_p3 = pnand %p2081_p2, %p2077_p13 }
  0xbe   : > { %v1530_v1 = vadd.f32 %v2515_v25, %v1496_v5  ;;  %v2577_v28 = vpop.f32.mrf.mxu3 }
  0xbf   : > { %v765_v16 = vpop.f32.mrf.mxu0  ;;  %v1387_v17 = vpop.f32.mrf.mxu2 }
  0xc0   : > { %vm1562_vm9 = vcmp.ge.f32.partialorder %v1530_v1, 0.0  ;;  %v1594_v21 = vmul.f32 0.2, %v1530_v1  ;;  %v1007_v23 = vadd.f32 %v1006_v55, %v765_v16  ;;  %v1009_v3 = vpop.f32.mrf.mxu1  ;;  %v506_v55 = vor.u32 %v505_v41, %v502_v40 }
  0xc1   : > { %v1925_v16 = vrot.slane %v1094_v38, 9  ;;  %v1282_v40 = vunpack.c.l.b16 %v1241_v37 }
  0xc2   : > { %v1626_v30 = vsel %vm1562_vm9, %v1530_v1, %v1594_v21  ;;  %v1463_v31 = vadd.f32 %v1387_v17, %v1007_v23  ;;  %v507_v9 = vrot.slane %v506_v55, 4  ;;  %v1273_v1 = vunpack.c.l.b16 %v1210_v63 }
  0xc3   : > { %1658 = vst.msk [vmem:[%s2545_s20 + $0x10] sm:$0xff] %vm700_vm2, %v1626_v30  ;;  %1904 = vmatmul.msk.bf16.gmra.mxu1 %vm700_vm2, %v1982_v18  ;;  %v1238_v43 = vsel %vm2254_vm5, %v1925_v16, %v1237_v8 }
  0xc4   : > { %v1497_v6 = vmul.f32 %v2506_v51, %v1463_v31  ;;  %1960 = vmatmul.msk.bf16.gmra.mxu2 %vm700_vm2, %v1293_v26  ;;  %v512_v13 = vsel %vm2280_vm6, %v507_v9, %v511_v44  ;;  %v1294_v26 = vpack.c.b16 %v1274_v15, %v1273_v1  ;;  %v651_v31 = vunpack.c.l.b16 %v522_v42 }
  0xc5   : > { %v650_v30 = vunpack.c.l.b16 %v512_v13  ;;  %v1281_v39 = vunpack.c.l.b16 %v1238_v43 }
  0xc6   : > { %v1531_v49 = vadd.f32 %v2515_v25, %v1497_v6  ;;  %v2591_v62 = vpop.f32.mrf.mxu3 }
  0xc7   : > { %v768_v53 = vpop.f32.mrf.mxu0  ;;  %v1390_v54 = vpop.f32.mrf.mxu2  ;;  %v671_v36 = vpack.c.b16 %v651_v31, %v650_v30 }
  0xc8   : > { %vm1563_vm10 = vcmp.ge.f32.partialorder %v1531_v49, 0.0  ;;  %v1595_v59 = vmul.f32 0.2, %v1531_v49  ;;  %v1010_v60 = vadd.f32 %v1009_v3, %v768_v53  ;;  %v1011_v61 = vpop.f32.mrf.mxu1 }
  0xca   : > { %v1627_v2 = vsel %vm1563_vm10, %v1531_v49, %v1595_v59  ;;  %v1464_v5 = vadd.f32 %v1390_v54, %v1010_v60  ;;  %1808 = vmatmul.msk.bf16.gmra.mxu0 %vm700_vm2, %v670_v50  ;;  %v1298_v49 = vpack.c.b16 %v1282_v40, %v1281_v39 }
  0xcb   : > { %1659 = vst.msk [vmem:[%s2545_s20 + $0x18] sm:$0xff] %vm700_vm2, %v1627_v2  ;;  %1964 = vmatmul.msk.bf16.gmra.mxu3 %vm700_vm2, %v1297_v10 }
  0xcc   : > { %v1498_v22 = vmul.f32 %v2506_v51, %v1464_v5 }
  0xce   : > { %v1532_v27 = vadd.f32 %v2515_v25, %v1498_v22  ;;  %v2611_v33 = vpop.f32.mrf.mxu3 }
  0xcf   : > { %v770_v17 = vpop.f32.mrf.mxu0  ;;  %v1392_v18 = vpop.f32.mrf.mxu2 }
  0xd0   : > { %vm1564_vm11 = vcmp.ge.f32.partialorder %v1532_v27, 0.0  ;;  %v1596_v21 = vmul.f32 0.2, %v1532_v27  ;;  %v1012_v23 = vadd.f32 %v1011_v61, %v770_v17  ;;  %v1014_v3 = vpop.f32.mrf.mxu1 }
  0xd2   : > { %v1628_v4 = vsel %vm1564_vm11, %v1532_v27, %v1596_v21  ;;  %v1465_v29 = vadd.f32 %v1392_v18, %v1012_v23 }
  0xd3   : > { %1660 = vst.msk [vmem:[%s2545_s20 + $0x20] sm:$0xff] %vm700_vm2, %v1628_v4  ;;  %1905 = vmatmul.msk.bf16.gmra.mxu1 %vm700_vm2, %v1983_v19 }
  0xd4   : > { %v1499_v34 = vmul.f32 %v2506_v51, %v1465_v29  ;;  %1961 = vmatmul.msk.bf16.gmra.mxu2 %vm700_vm2, %v1294_v26 }
  0xd6   : > { %v1533_v35 = vadd.f32 %v2515_v25, %v1499_v34  ;;  %v2623_v47 = vpop.f32.mrf.mxu3 }
  0xd7   : > { %v773_v41 = vpop.f32.mrf.mxu0  ;;  %v1395_v44 = vpop.f32.mrf.mxu2 }
  0xd8   : > { %vm1565_vm12 = vcmp.ge.f32.partialorder %v1533_v35, 0.0  ;;  %v1597_v45 = vmul.f32 0.2, %v1533_v35  ;;  %v1015_v6 = vadd.f32 %v1014_v3, %v773_v41  ;;  %v1016_v46 = vpop.f32.mrf.mxu1 }
  0xda   : > { %v1629_v14 = vsel %vm1565_vm12, %v1533_v35, %v1597_v45  ;;  %v1466_v48 = vadd.f32 %v1395_v44, %v1015_v6  ;;  %1809 = vmatmul.msk.bf16.gmra.mxu0 %vm700_vm2, %v671_v36 }
  0xdb   : > { %1661 = vst.msk [vmem:[%s2545_s20 + $0x28] sm:$0xff] %vm700_vm2, %v1629_v14  ;;  %1965 = vmatmul.msk.bf16.gmra.mxu3 %vm700_vm2, %v1298_v49 }
  0xdc   : > { %v1500_v50 = vmul.f32 %v2506_v51, %v1466_v48 }
  0xde   : > { %v1534_v7 = vadd.f32 %v2515_v25, %v1500_v50  ;;  %v2631_v58 = vpop.f32.mrf.mxu3 }
  0xdf   : > { %v775_v52 = vpop.f32.mrf.mxu0  ;;  %v1397_v53 = vpop.f32.mrf.mxu2 }
  0xe0   : > { %vm1566_vm13 = vcmp.ge.f32.partialorder %v1534_v7, 0.0  ;;  %v1598_v54 = vmul.f32 0.2, %v1534_v7  ;;  %v1017_v55 = vadd.f32 %v1016_v46, %v775_v52  ;;  %v1019_v57 = vpop.f32.mrf.mxu1 }
  0xe2   : > { %v1630_v59 = vsel %vm1566_vm13, %v1534_v7, %v1598_v54  ;;  %v1467_v60 = vadd.f32 %v1397_v53, %v1017_v55 }
  0xe3   : > { %1662 = vst.msk [vmem:[%s2545_s20 + $0x30] sm:$0xff] %vm700_vm2, %v1630_v59 }
  0xe4   : > { %v1501_v61 = vmul.f32 %v2506_v51, %v1467_v60 }
  0xe6   : > { %v1535_v63 = vadd.f32 %v2515_v25, %v1501_v61  ;;  %v2637_v9 = vpop.f32.mrf.mxu3 }
  0xe7   : > { %v778_v0 = vpop.f32.mrf.mxu0  ;;  %v1400_v2 = vpop.f32.mrf.mxu2 }
  0xe8   : > { %vm1567_vm14 = vcmp.ge.f32.partialorder %v1535_v63, 0.0  ;;  %v1599_v5 = vmul.f32 0.2, %v1535_v63  ;;  %v1020_v10 = vadd.f32 %v1019_v57, %v778_v0  ;;  %v1021_v8 = vpop.f32.mrf.mxu1 }
  0xea   : > { %v1631_v11 = vsel %vm1567_vm14, %v1535_v63, %v1599_v5  ;;  %v1468_v12 = vadd.f32 %v1400_v2, %v1020_v10 }
  0xeb   : > { %1663 = vst.msk [vmem:[%s2545_s20 + $0x38] sm:$0xff] %vm700_vm2, %v1631_v11 }
  0xec   : > { %v1502_v38 = vmul.f32 %v2506_v51, %v1468_v12 }
  0xee   : > { %v1536_v22 = vadd.f32 %v2515_v25, %v1502_v38  ;;  %v2643_v18 = vpop.f32.mrf.mxu3 }
  0xef   : > { %v780_v1 = vpop.f32.mrf.mxu0  ;;  %v1402_v15 = vpop.f32.mrf.mxu2 }
  0xf0   : > { %vm1568_vm15 = vcmp.ge.f32.partialorder %v1536_v22, 0.0  ;;  %v1600_v27 = vmul.f32 0.2, %v1536_v22  ;;  %v1022_v16 = vadd.f32 %v1021_v8, %v780_v1  ;;  %v1024_v17 = vpop.f32.mrf.mxu1 }
  0xf2   : > { %v1632_v19 = vsel %vm1568_vm15, %v1536_v22, %v1600_v27  ;;  %v1469_v13 = vadd.f32 %v1402_v15, %v1022_v16 }
  0xf3   : > { %1664 = vst.msk [vmem:[%s2545_s20 + $0x40] sm:$0xff] %vm700_vm2, %v1632_v19 }
  0xf4   : > { %v1503_v42 = vmul.f32 %v2506_v51, %v1469_v13 }
  0xf6   : > { %v1537_v20 = vadd.f32 %v2515_v25, %v1503_v42  ;;  %v2649_v4 = vpop.f32.mrf.mxu3 }
  0xf7   : > { %v783_v32 = vpop.f32.mrf.mxu0  ;;  %v1405_v21 = vpop.f32.mrf.mxu2 }
  0xf8   : > { %vm1569_vm0 = vcmp.ge.f32.partialorder %v1537_v20, 0.0  ;;  %v1601_v23 = vmul.f32 0.2, %v1537_v20  ;;  %v1025_v3 = vadd.f32 %v1024_v17, %v783_v32  ;;  %v1026_v26 = vpop.f32.mrf.mxu1 }
  0xfa   : > { %v1633_v29 = vsel %vm1569_vm0, %v1537_v20, %v1601_v23  ;;  %v1470_v30 = vadd.f32 %v1405_v21, %v1025_v3 }
  0xfb   : > { %1665 = vst.msk [vmem:[%s2545_s20 + $0x48] sm:$0xff] %vm700_vm2, %v1633_v29 }
  0xfc   : > { %v1504_v31 = vmul.f32 %v2506_v51, %v1470_v30 }
  0xfe   : > { %v1538_v43 = vadd.f32 %v2515_v25, %v1504_v31  ;;  %v2655_v40 = vpop.f32.mrf.mxu3 }
  0xff   : > { %v785_v37 = vpop.f32.mrf.mxu0  ;;  %v1407_v34 = vpop.f32.mrf.mxu2 }
 0x100   : > { %vm1570_vm1 = vcmp.ge.f32.partialorder %v1538_v43, 0.0  ;;  %v1602_v35 = vmul.f32 0.2, %v1538_v43  ;;  %v1027_v36 = vadd.f32 %v1026_v26, %v785_v37  ;;  %v1029_v39 = vpop.f32.mrf.mxu1 }
 0x102   : > { %v1634_v41 = vsel %vm1570_vm1, %v1538_v43, %v1602_v35  ;;  %v1471_v44 = vadd.f32 %v1407_v34, %v1027_v36 }
 0x103   : > { %1666 = vst.msk [vmem:[%s2545_s20 + $0x50] sm:$0xff] %vm700_vm2, %v1634_v41 }
 0x104   : > { %v1505_v45 = vmul.f32 %v2506_v51, %v1471_v44 }
 0x106   : > { %v1539_v6 = vadd.f32 %v2515_v25, %v1505_v45  ;;  %v2661_v7 = vpop.f32.mrf.mxu3 }
 0x107   : > { %v788_v46 = vpop.f32.mrf.mxu0  ;;  %v1410_v14 = vpop.f32.mrf.mxu2 }
 0x108   : > { %vm1571_vm3 = vcmp.ge.f32.partialorder %v1539_v6, 0.0  ;;  %v1603_v48 = vmul.f32 0.2, %v1539_v6  ;;  %v1030_v49 = vadd.f32 %v1029_v39, %v788_v46  ;;  %v1031_v50 = vpop.f32.mrf.mxu1 }
 0x10a   : > { %v1635_v52 = vsel %vm1571_vm3, %v1539_v6, %v1603_v48  ;;  %v1472_v53 = vadd.f32 %v1410_v14, %v1030_v49  ;;  %v1060_v14 = vadd.f32 %v2643_v18, %v2538_v24  ;;  %v1062_v24 = vadd.f32 %v2649_v4, %v2554_v56 }
 0x10b   : > { %1667 = vst.msk [vmem:[%s2545_s20 + $0x58] sm:$0xff] %vm700_vm2, %v1635_v52 }
 0x10c   : > { %v1506_v54 = vmul.f32 %v2506_v51, %v1472_v53 }
 0x10e   : > { %v1540_v55 = vadd.f32 %v2515_v25, %v1506_v54  ;;  %v2667_v0 = vpop.f32.mrf.mxu3 }
 0x10f   : > { %v790_v57 = vpop.f32.mrf.mxu0  ;;  %v1412_v59 = vpop.f32.mrf.mxu2 }
 0x110   : > { %vm1572_vm4 = vcmp.ge.f32.partialorder %v1540_v55, 0.0  ;;  %v1604_v60 = vmul.f32 0.2, %v1540_v55  ;;  %v1032_v61 = vadd.f32 %v1031_v50, %v790_v57  ;;  %v1034_v63 = vpop.f32.mrf.mxu1 }
 0x112   : > { %v1636_v2 = vsel %vm1572_vm4, %v1540_v55, %v1604_v60  ;;  %v1473_v5 = vadd.f32 %v1412_v59, %v1032_v61 }
 0x113   : > { %1668 = vst.msk [vmem:[%s2545_s20 + $0x60] sm:$0xff] %vm700_vm2, %v1636_v2 }
 0x114   : > { %v1507_v10 = vmul.f32 %v2506_v51, %v1473_v5 }
 0x116   : > { %v1541_v8 = vadd.f32 %v2515_v25, %v1507_v10  ;;  %v2673_v15 = vpop.f32.mrf.mxu3 }
 0x117   : > { %v793_v11 = vpop.f32.mrf.mxu0  ;;  %v1415_v12 = vpop.f32.mrf.mxu2 }
 0x118   : > { %vm1573_vm5 = vcmp.ge.f32.partialorder %v1541_v8, 0.0  ;;  %v1605_v38 = vmul.f32 0.2, %v1541_v8  ;;  %v1035_v22 = vadd.f32 %v1034_v63, %v793_v11  ;;  %v1036_v1 = vpop.f32.mrf.mxu1 }
 0x11a   : > { %v1637_v27 = vsel %vm1573_vm5, %v1541_v8, %v1605_v38  ;;  %v1474_v16 = vadd.f32 %v1415_v12, %v1035_v22 }
 0x11b   : > { %1669 = vst.msk [vmem:[%s2545_s20 + $0x68] sm:$0xff] %vm700_vm2, %v1637_v27 }
 0x11c   : > { %v1508_v17 = vmul.f32 %v2506_v51, %v1474_v16 }
 0x11e   : > { %v1542_v19 = vadd.f32 %v2515_v25, %v1508_v17  ;;  %v2679_v23 = vpop.f32.mrf.mxu3 }
 0x11f   : > { %v795_v13 = vpop.f32.mrf.mxu0  ;;  %v1417_v42 = vpop.f32.mrf.mxu2 }
 0x120   : > { %vm1574_vm6 = vcmp.ge.f32.partialorder %v1542_v19, 0.0  ;;  %v1606_v20 = vmul.f32 0.2, %v1542_v19  ;;  %v1037_v32 = vadd.f32 %v1036_v1, %v795_v13  ;;  %v1039_v21 = vpop.f32.mrf.mxu1  ;;  %v1065_v13 = vadd.f32 %v2655_v40, %v2577_v28 }
 0x122   : > { %v1638_v3 = vsel %vm1574_vm6, %v1542_v19, %v1606_v20  ;;  %v1475_v26 = vadd.f32 %v1417_v42, %v1037_v32 }
 0x123   : > { %1670 = vst.msk [vmem:[%s2545_s20 + $0x70] sm:$0xff] %vm700_vm2, %v1638_v3 }
 0x124   : > { %v1509_v29 = vmul.f32 %v2506_v51, %v1475_v26 }
 0x126   : > { %v1543_v30 = vadd.f32 %v2515_v25, %v1509_v29  ;;  %v2685_v36 = vpop.f32.mrf.mxu3 }
 0x127   : > { %v798_v31 = vpop.f32.mrf.mxu0  ;;  %v1420_v43 = vpop.f32.mrf.mxu2 }
 0x128   : > { %vm1575_vm7 = vcmp.ge.f32.partialorder %v1543_v30, 0.0  ;;  %v1607_v37 = vmul.f32 0.2, %v1543_v30  ;;  %v1040_v34 = vadd.f32 %v1039_v21, %v798_v31  ;;  %v1041_v35 = vpop.f32.mrf.mxu1 }
 0x12a   : > { %v1639_v39 = vsel %vm1575_vm7, %v1543_v30, %v1607_v37  ;;  %v1476_v41 = vadd.f32 %v1420_v43, %v1040_v34  ;;  %v1067_v34 = vadd.f32 %v2661_v7, %v2591_v62 }
 0x12b   : > { %1671 = vst.msk [vmem:[%s2545_s20 + $0x78] sm:$0xff] %vm700_vm2, %v1639_v39 }
 0x12c   : > { %v1510_v44 = vmul.f32 %v2506_v51, %v1476_v41 }
 0x12e   : > { %v1544_v45 = vadd.f32 %v2515_v25, %v1510_v44  ;;  %v1440_v52 = vpop.f32.mrf.mxu3 }
 0x12f   : > { %v800_v6 = vpop.f32.mrf.mxu0  ;;  %v1422_v46 = vpop.f32.mrf.mxu2  ;;  %v1484_v54 = vadd.f32 %v1440_v52, %v1060_v14 }
 0x130   : > { %vm1576_vm8 = vcmp.ge.f32.partialorder %v1544_v45, 0.0  ;;  %v1608_v48 = vmul.f32 0.2, %v1544_v45  ;;  %v1042_v49 = vadd.f32 %v1041_v35, %v800_v6  ;;  %v1044_v50 = vpop.f32.mrf.mxu1 }
 0x131   : > { %v1518_v57 = vmul.f32 %v2506_v51, %v1484_v54 }
 0x132   : > { %v1640_v53 = vsel %vm1576_vm8, %v1544_v45, %v1608_v48  ;;  %v1477_v55 = vadd.f32 %v1422_v46, %v1042_v49 }
 0x133   : > { %1672 = vst.msk [vmem:[%s2545_s20 + $0x80] sm:$0xff] %vm700_vm2, %v1640_v53  ;;  %v1552_v60 = vadd.f32 %v2515_v25, %v1518_v57  ;;  %v1070_v57 = vadd.f32 %v2667_v0, %v2611_v33 }
 0x134   : > { %v1511_v59 = vmul.f32 %v2506_v51, %v1477_v55 }
 0x135   : > { %vm1584_vm9 = vcmp.ge.f32.partialorder %v1552_v60, 0.0  ;;  %v1616_v2 = vmul.f32 0.2, %v1552_v60 }
 0x136   : > { %v1545_v61 = vadd.f32 %v2515_v25, %v1511_v59  ;;  %v1442_v8 = vpop.f32.mrf.mxu3 }
 0x137   : > { %v803_v18 = vpop.f32.mrf.mxu0  ;;  %v1425_v63 = vpop.f32.mrf.mxu2  ;;  %v1648_v12 = vsel %vm1584_vm9, %v1552_v60, %v1616_v2  ;;  %v1485_v22 = vadd.f32 %v1442_v8, %v1062_v24 }
 0x138   : > { %vm1577_vm10 = vcmp.ge.f32.partialorder %v1545_v61, 0.0  ;;  %v1609_v5 = vmul.f32 0.2, %v1545_v61  ;;  %v1046_v10 = vpop.f32.mrf.mxu1  ;;  %v1045_v11 = vadd.f32 %v1044_v50, %v803_v18  ;;  %1680 = vst.msk [vmem:[%s2545_s20 + $0xc0] sm:$0xff] %vm700_vm2, %v1648_v12  ;;  %v1072_v12 = vadd.f32 %v2673_v15, %v2623_v47 }
 0x139   : > { %v1519_v27 = vmul.f32 %v2506_v51, %v1485_v22 }
 0x13a   : > { %v1641_v38 = vsel %vm1577_vm10, %v1545_v61, %v1609_v5  ;;  %v1478_v1 = vadd.f32 %v1425_v63, %v1045_v11 }
 0x13b   : > { %1673 = vst.msk [vmem:[%s2545_s20 + $0x88] sm:$0xff] %vm700_vm2, %v1641_v38  ;;  %v1553_v4 = vadd.f32 %v2515_v25, %v1519_v27 }
 0x13c   : > { %v1512_v56 = vmul.f32 %v2506_v51, %v1478_v1 }
 0x13d   : > { %vm1585_vm11 = vcmp.ge.f32.partialorder %v1553_v4, 0.0  ;;  %v1617_v42 = vmul.f32 0.2, %v1553_v4 }
 0x13e   : > { %v1546_v16 = vadd.f32 %v2515_v25, %v1512_v56  ;;  %v1445_v3 = vpop.f32.mrf.mxu3 }
 0x13f   : > { %v805_v17 = vpop.f32.mrf.mxu0  ;;  %v1427_v19 = vpop.f32.mrf.mxu2  ;;  %v1649_v26 = vsel %vm1585_vm11, %v1553_v4, %v1617_v42  ;;  %v1486_v29 = vadd.f32 %v1445_v3, %v1065_v13 }
 0x140   : > { %v1047_v20 = vadd.f32 %v1046_v10, %v805_v17  ;;  %v1049_v32 = vpop.f32.mrf.mxu1  ;;  %vm1578_vm12 = vcmp.ge.f32.partialorder %v1546_v16, 0.0  ;;  %v1610_v21 = vmul.f32 0.2, %v1546_v16  ;;  %1681 = vst.msk [vmem:[%s2545_s20 + $0xc8] sm:$0xff] %vm700_vm2, %v1649_v26  ;;  %v1075_v26 = vadd.f32 %v2679_v23, %v2631_v58 }
 0x141   : > { %v1520_v43 = vmul.f32 %v2506_v51, %v1486_v29 }
 0x142   : > { %v1479_v30 = vadd.f32 %v1427_v19, %v1047_v20  ;;  %v1642_v31 = vsel %vm1578_vm12, %v1546_v16, %v1610_v21 }
 0x143   : > { %1674 = vst.msk [vmem:[%s2545_s20 + $0x90] sm:$0xff] %vm700_vm2, %v1642_v31  ;;  %v1554_v28 = vadd.f32 %v2515_v25, %v1520_v43 }
 0x144   : > { %v1513_v37 = vmul.f32 %v2506_v51, %v1479_v30 }
 0x145   : > { %vm1586_vm13 = vcmp.ge.f32.partialorder %v1554_v28, 0.0  ;;  %v1618_v41 = vmul.f32 0.2, %v1554_v28 }
 0x146   : > { %v1547_v40 = vadd.f32 %v2515_v25, %v1513_v37  ;;  %v1447_v45 = vpop.f32.mrf.mxu3 }
 0x147   : > { %v808_v35 = vpop.f32.mrf.mxu0  ;;  %v1430_v39 = vpop.f32.mrf.mxu2  ;;  %v1650_v46 = vsel %vm1586_vm13, %v1554_v28, %v1618_v41  ;;  %v1487_v48 = vadd.f32 %v1447_v45, %v1067_v34  ;;  %v1077_v41 = vadd.f32 %v2685_v36, %v2637_v9 }
 0x148   : > { %vm1579_vm14 = vcmp.ge.f32.partialorder %v1547_v40, 0.0  ;;  %v1611_v44 = vmul.f32 0.2, %v1547_v40  ;;  %v1050_v6 = vadd.f32 %v1049_v32, %v808_v35  ;;  %v1051_v49 = vpop.f32.mrf.mxu1  ;;  %1682 = vst.msk [vmem:[%s2545_s20 + $0xd0] sm:$0xff] %vm700_vm2, %v1650_v46 }
 0x149   : > { %v1521_v52 = vmul.f32 %v2506_v51, %v1487_v48 }
 0x14a   : > { %v1643_v14 = vsel %vm1579_vm14, %v1547_v40, %v1611_v44  ;;  %v1480_v50 = vadd.f32 %v1430_v39, %v1050_v6 }
 0x14b   : > { %1675 = vst.msk [vmem:[%s2545_s20 + $0x98] sm:$0xff] %vm700_vm2, %v1643_v14  ;;  %v1555_v7 = vadd.f32 %v2515_v25, %v1521_v52 }
 0x14c   : > { %v1514_v62 = vmul.f32 %v2506_v51, %v1480_v50 }
 0x14d   : > { %vm1587_vm15 = vcmp.ge.f32.partialorder %v1555_v7, 0.0  ;;  %v1619_v59 = vmul.f32 0.2, %v1555_v7 }
 0x14e   : > { %v1548_v53 = vadd.f32 %v2515_v25, %v1514_v62  ;;  %v1450_v24 = vpop.f32.mrf.mxu3 }
 0x14f   : > { %v810_v54 = vpop.f32.mrf.mxu0  ;;  %v1432_v55 = vpop.f32.mrf.mxu2  ;;  %v1651_v18 = vsel %vm1587_vm15, %v1555_v7, %v1619_v59  ;;  %v1488_v63 = vadd.f32 %v1450_v24, %v1070_v57 }
 0x150   : > { %v1052_v60 = vadd.f32 %v1051_v49, %v810_v54  ;;  %vm1580_vm0 = vcmp.ge.f32.partialorder %v1548_v53, 0.0  ;;  %v1612_v61 = vmul.f32 0.2, %v1548_v53  ;;  %1683 = vst.msk [vmem:[%s2545_s20 + $0xd8] sm:$0xff] %vm700_vm2, %v1651_v18  ;;  %v1054_v33 = vpop.f32.mrf.mxu1 }
 0x151   : > { %v1522_v10 = vmul.f32 %v2506_v51, %v1488_v63 }
 0x152   : > { %v1481_v2 = vadd.f32 %v1432_v55, %v1052_v60  ;;  %v1644_v5 = vsel %vm1580_vm0, %v1548_v53, %v1612_v61 }
 0x153   : > { %1676 = vst.msk [vmem:[%s2545_s20 + $0xa0] sm:$0xff] %vm700_vm2, %v1644_v5  ;;  %v1556_v0 = vadd.f32 %v2515_v25, %v1522_v10 }
 0x154   : > { %v1515_v8 = vmul.f32 %v2506_v51, %v1481_v2 }
 0x155   : > { %vm1588_vm1 = vcmp.ge.f32.partialorder %v1556_v0, 0.0  ;;  %v1620_v1 = vmul.f32 0.2, %v1556_v0 }
 0x156   : > { %v1549_v11 = vadd.f32 %v2515_v25, %v1515_v8  ;;  %v1452_v56 = vpop.f32.mrf.mxu3 }
 0x157   : > { %v813_v38 = vpop.f32.mrf.mxu0  ;;  %v1435_v22 = vpop.f32.mrf.mxu2  ;;  %v1652_v16 = vsel %vm1588_vm1, %v1556_v0, %v1620_v1  ;;  %v1489_v19 = vadd.f32 %v1452_v56, %v1072_v12 }
 0x158   : > { %vm1581_vm3 = vcmp.ge.f32.partialorder %v1549_v11, 0.0  ;;  %v1613_v27 = vmul.f32 0.2, %v1549_v11  ;;  %v1055_v4 = vadd.f32 %v1054_v33, %v813_v38  ;;  %1684 = vst.msk [vmem:[%s2545_s20 + $0xe0] sm:$0xff] %vm700_vm2, %v1652_v16  ;;  %v1056_v20 = vpop.f32.mrf.mxu1 }
 0x159   : > { %v1523_v42 = vmul.f32 %v2506_v51, %v1489_v19 }
 0x15a   : > { %v1645_v17 = vsel %vm1581_vm3, %v1549_v11, %v1613_v27  ;;  %v1482_v13 = vadd.f32 %v1435_v22, %v1055_v4 }
 0x15b   : > { %1677 = vst.msk [vmem:[%s2545_s20 + $0xa8] sm:$0xff] %vm700_vm2, %v1645_v17  ;;  %v1557_v15 = vadd.f32 %v2515_v25, %v1523_v42 }
 0x15c   : > { %v1516_v47 = vmul.f32 %v2506_v51, %v1482_v13 }
 0x15d   : > { %vm1589_vm4 = vcmp.ge.f32.partialorder %v1557_v15, 0.0  ;;  %v1621_v29 = vmul.f32 0.2, %v1557_v15 }
 0x15e   : > { %v1550_v32 = vadd.f32 %v2515_v25, %v1516_v47  ;;  %v1455_v43 = vpop.f32.mrf.mxu3 }
 0x15f   : > { %v815_v21 = vpop.f32.mrf.mxu0  ;;  %v1437_v3 = vpop.f32.mrf.mxu2  ;;  %v1653_v37 = vsel %vm1589_vm4, %v1557_v15, %v1621_v29  ;;  %v1490_v28 = vadd.f32 %v1455_v43, %v1075_v26 }
 0x160   : > { %v1057_v30 = vadd.f32 %v1056_v20, %v815_v21  ;;  %vm1582_vm5 = vcmp.ge.f32.partialorder %v1550_v32, 0.0  ;;  %v1614_v31 = vmul.f32 0.2, %v1550_v32  ;;  %1685 = vst.msk [vmem:[%s2545_s20 + $0xe8] sm:$0xff] %vm700_vm2, %v1653_v37 }
 0x161   : > { %v1524_v35 = vmul.f32 %v2506_v51, %v1490_v28 }
 0x162   : > { %v1483_v40 = vadd.f32 %v1437_v3, %v1057_v30  ;;  %v1646_v34 = vsel %vm1582_vm5, %v1550_v32, %v1614_v31 }
 0x163   : > { %1678 = vst.msk [vmem:[%s2545_s20 + $0xb0] sm:$0xff] %vm700_vm2, %v1646_v34  ;;  %v1558_v23 = vadd.f32 %v2515_v25, %v1524_v35 }
 0x164   : > { %v1517_v58 = vmul.f32 %v2506_v51, %v1483_v40 }
 0x165   : > { %vm1590_vm6 = vcmp.ge.f32.partialorder %v1558_v23, 0.0  ;;  %v1622_v44 = vmul.f32 0.2, %v1558_v23 }
 0x166   : > { %v1551_v39 = vadd.f32 %v2515_v25, %v1517_v58  ;;  %v1457_v6 = vpop.f32.mrf.mxu3 }
 0x167   : > { %v1654_v46 = vsel %vm1590_vm6, %v1558_v23, %v1622_v44  ;;  %v1491_v48 = vadd.f32 %v1457_v6, %v1077_v41 }
 0x168   : > { %vm1583_vm7 = vcmp.ge.f32.partialorder %v1551_v39, 0.0  ;;  %v1615_v45 = vmul.f32 0.2, %v1551_v39  ;;  %1686 = vst.msk [vmem:[%s2545_s20 + $0xf0] sm:$0xff] %vm700_vm2, %v1654_v46 }
 0x169   : > { %v1525_v9 = vmul.f32 %v2506_v51, %v1491_v48 }
 0x16a   : > { %v1647_v14 = vsel %vm1583_vm7, %v1551_v39, %v1615_v45 }
 0x16b   : > { %1679 = vst.msk [vmem:[%s2545_s20 + $0xb8] sm:$0xff] %vm700_vm2, %v1647_v14  ;;  %v1559_v36 = vadd.f32 %v2515_v25, %v1525_v9 }
 0x16d   : > { %vm1591_vm8 = vcmp.ge.f32.partialorder %v1559_v36, 0.0  ;;  %v1623_v49 = vmul.f32 0.2, %v1559_v36 }
 0x16f   : > { %v1655_v50 = vsel %vm1591_vm8, %v1559_v36, %v1623_v49 }
 0x170   : > { %1687 = vst.msk [vmem:[%s2545_s20 + $0xf8] sm:$0xff] %vm700_vm2, %v1655_v50 }
 0x171   : > { %2085 = shalt.err (!%p2082_p3)
}
 0x172   : > { %s2122_s10 = smov 128   ;;  %s2123_s11 = smov 8  }
 0x173   : > { %2015 = dma.vmem_to_hbm [thread:$0]  (%p2182_p5), %s1703_s16, 4096, %s1705_s28, %s1689_s29, %s2122_s10, %s2122_s10, %s2123_s11  }
 0x174 PF: > { %p2021_p4 = scmp.ge.s32.totalorder %s2120_s15, 2  ;;  %s1719_s17 = sand.u32 1, %s2108_s12  }
 0x175   : > { %s1720_s19 = scalar_lea.sflag [#allocation3], %s1719_s17 }
 0x176   : > { %p2018_p7 = pnand %p2021_p4, %p2186_p6 }
 0x178   : > { %p2019_p8 = pneg %p2018_p7 }
 0x17a   : > { %2103 = dma.done.wait (%p2019_p8), %s1720_s19, 4096  }
 0x17b   : > { %2105 = vsyncadd (%p2019_p8), %s1720_s19, 4294963200  ;;  %p13_p9 = scmp.ge.s32.totalorder %s2169_s18, 4   ;;  %s2813_s12 = smov %s2112_s13 }
 0x17c   : > { %s2814_s13 = smov %s2116_s14  ;;  %s2815_s14 = smov %s2180_s21 }
 0x17d   : > { %s2816_s15 = smov %s2169_s18  ;;  %15 = sbr.rel (!%p13_p9) target bundleno = 3 (0x3), region = 69 }
 0x182   :  { %1726 = vsyncpa [#allocation3], 1 }
 0x183   :  { %1728 = vsyncpa [#allocation3 + $0x1], 1 }

</bundles_post_ra>
